<compile_context>
chip_gen: v7x
topology: tpu7x:2x2x1
jax: 0.10.0
libtpu: 0.0.40
codegen_flags: <defaults>
</compile_context>

<pallas_src>
import functools

import jax
import jax.numpy as jnp
import numpy as np
from jax import lax
from jax.experimental import pallas as pl
from jax.experimental.pallas import tpu as pltpu

# ---------------- config (small, consistent with the module) ----------------
D_MODEL = 32          # cfg.d_model
NHEAD = 4             # cfg.nhead
DIM_FF = 64           # cfg.dim_feedforward
T_LEN = 8             # target sequence length
S_LEN = 16            # memory sequence length
BATCH = 2
LN_EPS = 1e-5


# ------------------------------ kernel helpers --------------------------------
def _layernorm(x, gamma, beta):
    mu = jnp.mean(x, axis=-1, keepdims=True)
    xc = x - mu
    var = jnp.mean(xc * xc, axis=-1, keepdims=True)
    return xc * lax.rsqrt(var + LN_EPS) * gamma + beta


def _bd_attention(q, k, v, hmask, bmask, nhead):
    """Block-diagonal multi-head attention core (no per-head transposes).

    q: (Nq, D), already scaled by 1/sqrt(dh).   k, v: (Nk, D).
    hmask: (H*Nk, D) 0/1, hmask[h*Nk + r, d] = (d // dh == h)   (head block-diagonal).
    bmask: (Nq, H*Nk) 0/1, 1 where query row and key row belong to the same batch item.
    Returns (Nq, D) with heads already concatenated along D.
    """
    k_bd = jnp.concatenate([k] * nhead, axis=0) * hmask   # (H*Nk, D) block-diag K
    v_bd = jnp.concatenate([v] * nhead, axis=0) * hmask   # (H*Nk, D) block-diag V

    # Per-head scores, all heads laid out along lanes: (Nq, H*Nk).
    s = lax.dot_general(q, k_bd, (((1,), (1,)), ((), ())),
                        preferred_element_type=jnp.float32)
    # Row-global max: softmax is shift-invariant, identical per head / per batch.
    s = s - jnp.max(s, axis=-1, keepdims=True)
    p = jnp.exp(s) * bmask                                 # zero cross-batch entries

    o = jnp.dot(p, v_bd, preferred_element_type=jnp.float32)        # (Nq, D) unnormalized
    denom = jnp.dot(p, hmask, preferred_element_type=jnp.float32)   # per-head sums, broadcast over dh lanes
    return o * pl.reciprocal(denom, approx=True)


# ------------------------------ kernel -----------------------------------------
def decoder_layer_kernel(nhead,
                         tgt_ref, mem_ref, qpos_ref, pos_ref,
                         sa_wqk_ref, sa_bqk_ref, sa_wvo_ref, sa_bvo_ref,
                         ca_w_ref, ca_b_ref,
                         w1t_ref, b1_ref, w2t_ref, b2_ref,
                         norm_ref,
                         hmask_sa_ref, bmask_sa_ref, hmask_ca_ref, bmask_ca_ref,
                         out_ref):
    x_t = tgt_ref[...]        # (T*B, D)   rows = (t, b) flattened, batch fastest
    x_m = mem_ref[...]        # (S*B, D)
    x_qp = qpos_ref[...]      # (T*B, D)
    x_pe = pos_ref[...]       # (S*B, D)
    norms = norm_ref[...]     # (6, D): g1, b1, g2, b2, g3, b3
    D = x_t.shape[-1]

    # --- self attention: q = k = tgt + query_pos, value = tgt ---
    qk_in = x_t + x_qp
    qk = jnp.dot(qk_in, sa_wqk_ref[...],
                 preferred_element_type=jnp.float32) + sa_bqk_ref[...]   # (N, 2D)
    q, k = qk[:, :D], qk[:, D:]
    v = jnp.dot(x_t, sa_wvo_ref[0],
                preferred_element_type=jnp.float32) + sa_bvo_ref[0:1, :]
    attn = _bd_attention(q, k, v, hmask_sa_ref[...], bmask_sa_ref[...], nhead)
    sa = jnp.dot(attn, sa_wvo_ref[1],
                 preferred_element_type=jnp.float32) + sa_bvo_ref[1:2, :]
    x = _layernorm(x_t + sa, norms[0:1, :], norms[1:2, :])

    # --- cross attention: q = x + query_pos, k = mem + pos, v = mem ---
    q = jnp.dot(x + x_qp, ca_w_ref[0],
                preferred_element_type=jnp.float32) + ca_b_ref[0:1, :]
    k = jnp.dot(x_m + x_pe, ca_w_ref[1],
                preferred_element_type=jnp.float32) + ca_b_ref[1:2, :]
    v = jnp.dot(x_m, ca_w_ref[2],
                preferred_element_type=jnp.float32) + ca_b_ref[2:3, :]
    attn = _bd_attention(q, k, v, hmask_ca_ref[...], bmask_ca_ref[...], nhead)
    ca = jnp.dot(attn, ca_w_ref[3],
                 preferred_element_type=jnp.float32) + ca_b_ref[3:4, :]
    x = _layernorm(x + ca, norms[2:3, :], norms[3:4, :])

    # --- feed-forward (relu activation) ---
    h = jnp.maximum(jnp.dot(x, w1t_ref[...],
                            preferred_element_type=jnp.float32) + b1_ref[...], 0.0)
    ff = jnp.dot(h, w2t_ref[...],
                 preferred_element_type=jnp.float32) + b2_ref[...]
    x = _layernorm(x + ff, norms[4:5, :], norms[5:6, :])

    out_ref[...] = x.astype(out_ref.dtype)   # one dense (T*B, D) store


# ------------------------- one-time parameter prep ------------------------------
def prepare_decoder_params(params):
    """Re-layout PyTorch-convention params once, outside the kernel:
    split in_proj, transpose every weight, fold the 1/sqrt(dh) scale into Wq/bq,
    and pack the shared-input self-attention Q|K projection into one (D, 2D) weight."""
    (sa_wi, sa_bi, sa_wo, sa_bo, ca_wi, ca_bi, ca_wo, ca_bo,
     w1, b1, w2, b2, norms) = params
    D = sa_wo.shape[0]
    scale = 1.0 / np.sqrt(D // NHEAD)

    def split(w_in, b_in):
        return (w_in[0:D], w_in[D:2 * D], w_in[2 * D:3 * D],
                b_in[0, 0:D], b_in[0, D:2 * D], b_in[0, 2 * D:3 * D])

    wq, wk, wv, bq, bk, bv = split(sa_wi, sa_bi)
    sa_wqk = jnp.concatenate([wq.T * scale, wk.T], axis=1).astype(jnp.float32)   # (D, 2D)
    sa_bqk = jnp.concatenate([bq * scale, bk])[None, :].astype(jnp.float32)      # (1, 2D)
    sa_wvo = jnp.stack([wv.T, sa_wo.T]).astype(jnp.float32)                      # (2, D, D)
    sa_bvo = jnp.stack([bv, sa_bo[0]]).astype(jnp.float32)                       # (2, D)

    wq, wk, wv, bq, bk, bv = split(ca_wi, ca_bi)
    ca_w = jnp.stack([wq.T * scale, wk.T, wv.T, ca_wo.T]).astype(jnp.float32)    # (4, D, D)
    ca_b = jnp.stack([bq * scale, bk, bv, ca_bo[0]]).astype(jnp.float32)         # (4, D)

    return (sa_wqk, sa_bqk, sa_wvo, sa_bvo, ca_w, ca_b,
            w1.T.astype(jnp.float32), b1.astype(jnp.float32),
            w2.T.astype(jnp.float32), b2.astype(jnp.float32),
            norms.astype(jnp.float32))


def _attn_masks(nq, nk, batch, d_model, nhead):
    """Constant 0/1 masks for the block-diagonal attention formulation."""
    dh = d_model // nhead
    col = np.arange(nhead * nk)
    head_of_col = col // nk
    hmask = (head_of_col[:, None] == (np.arange(d_model)[None, :] // dh)).astype(np.float32)
    q_batch = np.arange(nq) % batch
    k_batch = (col % nk) % batch
    bmask = (q_batch[:, None] == k_batch[None, :]).astype(np.float32)
    return jnp.asarray(hmask), jnp.asarray(bmask)


# ------------------------------ wrapper ------------------------------------------
def transformer_decoder_layer(tgt, memory, pos, query_pos, kparams):
    """tgt/query_pos: (T, B, D), memory/pos: (S, B, D).  Only free contiguous reshapes."""
    T, B, D = tgt.shape
    S = memory.shape[0]
    (sa_wqk, sa_bqk, sa_wvo, sa_bvo, ca_w, ca_b, w1t, b1, w2t, b2, norms) = kparams
    F = w1t.shape[1]
    H = NHEAD
    N, M = T * B, S * B

    hmask_sa, bmask_sa = _attn_masks(N, N, B, D, H)
    hmask_ca, bmask_ca = _attn_masks(N, M, B, D, H)

    # Contiguous collapse of (seq, batch) -> rows; no transposes, no relayout.
    tgt2 = tgt.reshape(N, D)
    mem2 = memory.reshape(M, D)
    qp2 = query_pos.reshape(N, D)
    pe2 = pos.reshape(M, D)

    full = lambda shape: pl.BlockSpec(shape, lambda i, s=shape: (0,) * len(s))

    out2 = pl.pallas_call(
        functools.partial(decoder_layer_kernel, H),
        out_shape=jax.ShapeDtypeStruct((N, D), jnp.float32),
        grid_spec=pltpu.PrefetchScalarGridSpec(
            num_scalar_prefetch=0,
            grid=(1,),                       # whole problem resident in VMEM
            in_specs=[
                full((N, D)),                # tgt rows
                full((M, D)),                # memory rows
                full((N, D)),                # query_pos rows
                full((M, D)),                # pos rows
                full((D, 2 * D)),            # self-attn [WqT*s | WkT]
                full((1, 2 * D)),            # self-attn [bq*s | bk]
                full((2, D, D)),             # self-attn [WvT, WoT]
                full((2, D)),                # self-attn [bv, bo]
                full((4, D, D)),             # cross-attn [WqT*s, WkT, WvT, WoT]
                full((4, D)),                # cross-attn [bq*s, bk, bv, bo]
                full((D, F)),                # linear1.weight^T
                full((1, F)),                # linear1.bias
                full((F, D)),                # linear2.weight^T
                full((1, D)),                # linear2.bias
                full((6, D)),                # [g1,b1,g2,b2,g3,b3]
                full((H * N, D)),            # self-attn head block-diag mask
                full((N, H * N)),            # self-attn same-batch mask
                full((H * M, D)),            # cross-attn head block-diag mask
                full((N, H * M)),            # cross-attn same-batch mask
            ],
            out_specs=full((N, D)),
        ),
        compiler_params=pltpu.CompilerParams(
            dimension_semantics=("arbitrary",)),
    )(tgt2, mem2, qp2, pe2, sa_wqk, sa_bqk, sa_wvo, sa_bvo, ca_w, ca_b,
      w1t, b1, w2t, b2, norms, hmask_sa, bmask_sa, hmask_ca, bmask_ca)

    return out2.reshape(T, B, D)


# ------------------------- pure-JAX reference (PyTorch-layout params) -------------
def _ref_mha(q_in, k_in, v_in, w_in, b_in, w_out, b_out, nhead):
    D = q_in.shape[-1]
    dh = D // nhead
    wq, wk, wv = w_in[0:D], w_in[D:2 * D], w_in[2 * D:3 * D]
    bq, bk, bv = b_in[0, 0:D], b_in[0, D:2 * D], b_in[0, 2 * D:3 * D]
    q = q_in @ wq.T + bq
    k = k_in @ wk.T + bk
    v = v_in @ wv.T + bv
    Tq, Tk = q.shape[0], k.shape[0]
    q = q.reshape(Tq, nhead, dh).transpose(1, 0, 2) / np.sqrt(dh)
    k = k.reshape(Tk, nhead, dh).transpose(1, 0, 2)
    v = v.reshape(Tk, nhead, dh).transpose(1, 0, 2)
    s = jnp.einsum("htd,hsd->hts", q, k)
    p = jax.nn.softmax(s, axis=-1)
    o = jnp.einsum("hts,hsd->htd", p, v).transpose(1, 0, 2).reshape(Tq, D)
    return o @ w_out.T + b_out[0]


def _ref_layernorm(x, g, b):
    mu = jnp.mean(x, -1, keepdims=True)
    var = jnp.mean((x - mu) ** 2, -1, keepdims=True)
    return (x - mu) / jnp.sqrt(var + LN_EPS) * g + b


def reference(tgt, memory, pos, query_pos, params):
    (sa_wi, sa_bi, sa_wo, sa_bo, ca_wi, ca_bi, ca_wo, ca_bo,
     w1, b1, w2, b2, norms) = params
    outs = []
    for b in range(tgt.shape[1]):
        t = tgt[:, b]
        m = memory[:, b]
        qp = query_pos[:, b]
        p = pos[:, b]
        q = t + qp
        x = _ref_layernorm(t + _ref_mha(q, q, t, sa_wi, sa_bi, sa_wo, sa_bo, NHEAD),
                           norms[0], norms[1])
        x = _ref_layernorm(x + _ref_mha(x + qp, m + p, m, ca_wi, ca_bi, ca_wo, ca_bo, NHEAD),
                           norms[2], norms[3])
        h = jnp.maximum(x @ w1.T + b1[0], 0.0)
        x = _ref_layernorm(x + (h @ w2.T + b2[0]), norms[4], norms[5])
        outs.append(x)
    return jnp.stack(outs, axis=1)


# ------------------------------ main -----------------------------------------------
if __name__ == "__main__":
    key = jax.random.PRNGKey(0)
    keys = jax.random.split(key, 16)

    D, F = D_MODEL, DIM_FF
    scale = 0.1
    sa_wi = jax.random.normal(keys[0], (3 * D, D), jnp.float32) * scale
    sa_bi = jax.random.normal(keys[1], (1, 3 * D), jnp.float32) * scale
    sa_wo = jax.random.normal(keys[2], (D, D), jnp.float32) * scale
    sa_bo = jax.random.normal(keys[3], (1, D), jnp.float32) * scale
    ca_wi = jax.random.normal(keys[4], (3 * D, D), jnp.float32) * scale
    ca_bi = jax.random.normal(keys[5], (1, 3 * D), jnp.float32) * scale
    ca_wo = jax.random.normal(keys[6], (D, D), jnp.float32) * scale
    ca_bo = jax.random.normal(keys[7], (1, D), jnp.float32) * scale
    w1 = jax.random.normal(keys[8], (F, D), jnp.float32) * scale
    b1 = jax.random.normal(keys[9], (1, F), jnp.float32) * scale
    w2 = jax.random.normal(keys[10], (D, F), jnp.float32) * scale
    b2 = jax.random.normal(keys[11], (1, D), jnp.float32) * scale
    # LayerNorm params: gamma=1, beta=0 (PyTorch default init), rows [g1,b1,g2,b2,g3,b3]
    norms = jnp.stack([jnp.ones(D), jnp.zeros(D),
                       jnp.ones(D), jnp.zeros(D),
                       jnp.ones(D), jnp.zeros(D)]).astype(jnp.float32)

    params = (sa_wi, sa_bi, sa_wo, sa_bo, ca_wi, ca_bi, ca_wo, ca_bo,
              w1, b1, w2, b2, norms)
    kparams = prepare_decoder_params(params)      # one-time weight re-layout

    tgt = jax.random.normal(keys[12], (T_LEN, BATCH, D), jnp.float32)
    memory = jax.random.normal(keys[13], (S_LEN, BATCH, D), jnp.float32)
    pos = jax.random.normal(keys[14], (S_LEN, BATCH, D), jnp.float32)
    query_pos = jax.random.normal(keys[15], (T_LEN, BATCH, D), jnp.float32)

    out = transformer_decoder_layer(tgt, memory, pos, query_pos, kparams)
    out = jax.block_until_ready(out)

    ref = reference(tgt, memory, pos, query_pos, params)
    # tolerance accommodates the approximate EUP reciprocal in the softmax denominator
    np.testing.assert_allclose(np.asarray(out), np.asarray(ref), rtol=2e-3, atol=2e-3)

    print("KERNEL_OK")
</pallas_src>

<mosaic_0001>
module attributes {stable_mosaic.version = 11 : i64} {
  func.func @decoder_layer_kernel(%arg0: i32, %arg1: memref<16x32xf32, #tpu.memory_space<vmem>>, %arg2: memref<32x32xf32, #tpu.memory_space<vmem>>, %arg3: memref<16x32xf32, #tpu.memory_space<vmem>>, %arg4: memref<32x32xf32, #tpu.memory_space<vmem>>, %arg5: memref<32x64xf32, #tpu.memory_space<vmem>>, %arg6: memref<1x64xf32, #tpu.memory_space<vmem>>, %arg7: memref<2x32x32xf32, #tpu.memory_space<vmem>>, %arg8: memref<2x32xf32, #tpu.memory_space<vmem>>, %arg9: memref<4x32x32xf32, #tpu.memory_space<vmem>>, %arg10: memref<4x32xf32, #tpu.memory_space<vmem>>, %arg11: memref<32x64xf32, #tpu.memory_space<vmem>>, %arg12: memref<1x64xf32, #tpu.memory_space<vmem>>, %arg13: memref<64x32xf32, #tpu.memory_space<vmem>>, %arg14: memref<1x32xf32, #tpu.memory_space<vmem>>, %arg15: memref<6x32xf32, #tpu.memory_space<vmem>>, %arg16: memref<64x32xf32, #tpu.memory_space<vmem>>, %arg17: memref<16x64xf32, #tpu.memory_space<vmem>>, %arg18: memref<128x32xf32, #tpu.memory_space<vmem>>, %arg19: memref<16x128xf32, #tpu.memory_space<vmem>>, %arg20: memref<16x32xf32, #tpu.memory_space<vmem>>) attributes {dimension_semantics = [#tpu.dimension_semantics<arbitrary>], iteration_bounds = array<i64: 1>, scalar_prefetch = 0 : i64, scratch_operands = 0 : i64, tpu.core_type = #tpu.core_type<tc>, window_params = [{pipeline_mode = #tpu.pipeline_mode<synchronous>, transform_indices = @transform_0, window_bounds = array<i64: 16, 32>}, {pipeline_mode = #tpu.pipeline_mode<synchronous>, transform_indices = @transform_1, window_bounds = array<i64: 32, 32>}, {pipeline_mode = #tpu.pipeline_mode<synchronous>, transform_indices = @transform_2, window_bounds = array<i64: 16, 32>}, {pipeline_mode = #tpu.pipeline_mode<synchronous>, transform_indices = @transform_3, window_bounds = array<i64: 32, 32>}, {pipeline_mode = #tpu.pipeline_mode<synchronous>, transform_indices = @transform_4, window_bounds = array<i64: 32, 64>}, {pipeline_mode = #tpu.pipeline_mode<synchronous>, transform_indices = @transform_5, window_bounds = array<i64: 1, 64>}, {pipeline_mode = #tpu.pipeline_mode<synchronous>, transform_indices = @transform_6, window_bounds = array<i64: 2, 32, 32>}, {pipeline_mode = #tpu.pipeline_mode<synchronous>, transform_indices = @transform_7, window_bounds = array<i64: 2, 32>}, {pipeline_mode = #tpu.pipeline_mode<synchronous>, transform_indices = @transform_8, window_bounds = array<i64: 4, 32, 32>}, {pipeline_mode = #tpu.pipeline_mode<synchronous>, transform_indices = @transform_9, window_bounds = array<i64: 4, 32>}, {pipeline_mode = #tpu.pipeline_mode<synchronous>, transform_indices = @transform_10, window_bounds = array<i64: 32, 64>}, {pipeline_mode = #tpu.pipeline_mode<synchronous>, transform_indices = @transform_11, window_bounds = array<i64: 1, 64>}, {pipeline_mode = #tpu.pipeline_mode<synchronous>, transform_indices = @transform_12, window_bounds = array<i64: 64, 32>}, {pipeline_mode = #tpu.pipeline_mode<synchronous>, transform_indices = @transform_13, window_bounds = array<i64: 1, 32>}, {pipeline_mode = #tpu.pipeline_mode<synchronous>, transform_indices = @transform_14, window_bounds = array<i64: 6, 32>}, {pipeline_mode = #tpu.pipeline_mode<synchronous>, transform_indices = @transform_15, window_bounds = array<i64: 64, 32>}, {pipeline_mode = #tpu.pipeline_mode<synchronous>, transform_indices = @transform_16, window_bounds = array<i64: 16, 64>}, {pipeline_mode = #tpu.pipeline_mode<synchronous>, transform_indices = @transform_17, window_bounds = array<i64: 128, 32>}, {pipeline_mode = #tpu.pipeline_mode<synchronous>, transform_indices = @transform_18, window_bounds = array<i64: 16, 128>}, {pipeline_mode = #tpu.pipeline_mode<synchronous>, transform_indices = @transform_19, window_bounds = array<i64: 16, 32>}]} {
    %c0 = arith.constant 0 : index
    %c0_0 = arith.constant 0 : index
    %0 = vector.load %arg1[%c0, %c0_0] : memref<16x32xf32, #tpu.memory_space<vmem>>, vector<16x32xf32>
    %c0_1 = arith.constant 0 : index
    %c0_2 = arith.constant 0 : index
    %1 = vector.load %arg2[%c0_1, %c0_2] : memref<32x32xf32, #tpu.memory_space<vmem>>, vector<32x32xf32>
    %c0_3 = arith.constant 0 : index
    %c0_4 = arith.constant 0 : index
    %2 = vector.load %arg3[%c0_3, %c0_4] : memref<16x32xf32, #tpu.memory_space<vmem>>, vector<16x32xf32>
    %c0_5 = arith.constant 0 : index
    %c0_6 = arith.constant 0 : index
    %3 = vector.load %arg4[%c0_5, %c0_6] : memref<32x32xf32, #tpu.memory_space<vmem>>, vector<32x32xf32>
    %c0_7 = arith.constant 0 : index
    %c0_8 = arith.constant 0 : index
    %4 = vector.load %arg15[%c0_7, %c0_8] : memref<6x32xf32, #tpu.memory_space<vmem>>, vector<6x32xf32>
    %5 = arith.addf %0, %2 : vector<16x32xf32>
    %c0_9 = arith.constant 0 : index
    %c0_10 = arith.constant 0 : index
    %6 = vector.load %arg5[%c0_9, %c0_10] : memref<32x64xf32, #tpu.memory_space<vmem>>, vector<32x64xf32>
    %cst = arith.constant dense<0.000000e+00> : vector<16x64xf32>
    %7 = tpu.matmul %5, %6, %cst {dimension_numbers = #tpu.dot_dimension_numbers<[1], [0], [0], [1], [0, 0, 1, 1], [], []>} : vector<16x32xf32>, vector<32x64xf32>, vector<16x64xf32> -> vector<16x64xf32>
    %c0_11 = arith.constant 0 : index
    %c0_12 = arith.constant 0 : index
    %8 = vector.load %arg6[%c0_11, %c0_12] : memref<1x64xf32, #tpu.memory_space<vmem>>, vector<1x64xf32>
    %9 = vector.broadcast %8 : vector<1x64xf32> to vector<16x64xf32>
    %10 = arith.addf %7, %9 : vector<16x64xf32>
    %11 = vector.extract_strided_slice %10 {offsets = [0, 0], sizes = [16, 32], strides = [1, 1]} : vector<16x64xf32> to vector<16x32xf32>
    %12 = vector.extract_strided_slice %10 {offsets = [0, 32], sizes = [16, 32], strides = [1, 1]} : vector<16x64xf32> to vector<16x32xf32>
    %c0_13 = arith.constant 0 : index
    %c0_14 = arith.constant 0 : index
    %c0_15 = arith.constant 0 : index
    %13 = vector.load %arg7[%c0_13, %c0_14, %c0_15] : memref<2x32x32xf32, #tpu.memory_space<vmem>>, vector<1x32x32xf32>
    %14 = vector.shape_cast %13 : vector<1x32x32xf32> to vector<32x32xf32>
    %cst_16 = arith.constant dense<0.000000e+00> : vector<16x32xf32>
    %15 = tpu.matmul %0, %14, %cst_16 {dimension_numbers = #tpu.dot_dimension_numbers<[1], [0], [0], [1], [0, 0, 1, 1], [], []>} : vector<16x32xf32>, vector<32x32xf32>, vector<16x32xf32> -> vector<16x32xf32>
    %c0_17 = arith.constant 0 : index
    %c0_18 = arith.constant 0 : index
    %16 = vector.load %arg8[%c0_17, %c0_18] : memref<2x32xf32, #tpu.memory_space<vmem>>, vector<1x32xf32>
    %17 = vector.broadcast %16 : vector<1x32xf32> to vector<16x32xf32>
    %18 = arith.addf %15, %17 : vector<16x32xf32>
    %c0_19 = arith.constant 0 : index
    %c0_20 = arith.constant 0 : index
    %19 = vector.load %arg16[%c0_19, %c0_20] : memref<64x32xf32, #tpu.memory_space<vmem>>, vector<64x32xf32>
    %c0_21 = arith.constant 0 : index
    %c0_22 = arith.constant 0 : index
    %20 = vector.load %arg17[%c0_21, %c0_22] : memref<16x64xf32, #tpu.memory_space<vmem>>, vector<16x64xf32>
    %21 = tpu.concatenate %12, %12, %12, %12 in 0 : vector<16x32xf32>, vector<16x32xf32>, vector<16x32xf32>, vector<16x32xf32> -> vector<64x32xf32>
    %22 = arith.mulf %21, %19 : vector<64x32xf32>
    %23 = tpu.concatenate %18, %18, %18, %18 in 0 : vector<16x32xf32>, vector<16x32xf32>, vector<16x32xf32>, vector<16x32xf32> -> vector<64x32xf32>
    %24 = arith.mulf %23, %19 : vector<64x32xf32>
    %cst_23 = arith.constant dense<0.000000e+00> : vector<16x64xf32>
    %25 = tpu.matmul %11, %22, %cst_23 {dimension_numbers = #tpu.dot_dimension_numbers<[1], [1], [0], [0], [0, 0, 1, 0], [], []>} : vector<16x32xf32>, vector<64x32xf32>, vector<16x64xf32> -> vector<16x64xf32>
    %cst_24 = arith.constant dense<0xFF800000> : vector<16xf32>
    %26 = vector.multi_reduction <maximumf>, %25, %cst_24 [1] : vector<16x64xf32> to vector<16xf32>
    %27 = vector.shape_cast %26 : vector<16xf32> to vector<16x1xf32>
    %28 = vector.broadcast %27 : vector<16x1xf32> to vector<16x64xf32>
    %29 = arith.subf %25, %28 : vector<16x64xf32>
    %30 = math.exp %29 : vector<16x64xf32>
    %31 = arith.mulf %30, %20 : vector<16x64xf32>
    %cst_25 = arith.constant dense<0.000000e+00> : vector<16x32xf32>
    %32 = tpu.matmul %31, %24, %cst_25 {dimension_numbers = #tpu.dot_dimension_numbers<[1], [0], [0], [1], [0, 0, 1, 1], [], []>} : vector<16x64xf32>, vector<64x32xf32>, vector<16x32xf32> -> vector<16x32xf32>
    %cst_26 = arith.constant dense<0.000000e+00> : vector<16x32xf32>
    %33 = tpu.matmul %31, %19, %cst_26 {dimension_numbers = #tpu.dot_dimension_numbers<[1], [0], [0], [1], [0, 0, 1, 1], [], []>} : vector<16x64xf32>, vector<64x32xf32>, vector<16x32xf32> -> vector<16x32xf32>
    %34 = tpu.reciprocal %33 {approx = true} : vector<16x32xf32> -> vector<16x32xf32>
    %35 = arith.mulf %32, %34 : vector<16x32xf32>
    %c1 = arith.constant 1 : index
    %c0_27 = arith.constant 0 : index
    %c0_28 = arith.constant 0 : index
    %36 = vector.load %arg7[%c1, %c0_27, %c0_28] : memref<2x32x32xf32, #tpu.memory_space<vmem>>, vector<1x32x32xf32>
    %37 = vector.shape_cast %36 : vector<1x32x32xf32> to vector<32x32xf32>
    %cst_29 = arith.constant dense<0.000000e+00> : vector<16x32xf32>
    %38 = tpu.matmul %35, %37, %cst_29 {dimension_numbers = #tpu.dot_dimension_numbers<[1], [0], [0], [1], [0, 0, 1, 1], [], []>} : vector<16x32xf32>, vector<32x32xf32>, vector<16x32xf32> -> vector<16x32xf32>
    %c1_30 = arith.constant 1 : index
    %c0_31 = arith.constant 0 : index
    %39 = vector.load %arg8[%c1_30, %c0_31] : memref<2x32xf32, #tpu.memory_space<vmem>>, vector<1x32xf32>
    %40 = vector.broadcast %39 : vector<1x32xf32> to vector<16x32xf32>
    %41 = arith.addf %38, %40 : vector<16x32xf32>
    %42 = arith.addf %0, %41 : vector<16x32xf32>
    %43 = vector.extract_strided_slice %4 {offsets = [0, 0], sizes = [1, 32], strides = [1, 1]} : vector<6x32xf32> to vector<1x32xf32>
    %44 = vector.extract_strided_slice %4 {offsets = [1, 0], sizes = [1, 32], strides = [1, 1]} : vector<6x32xf32> to vector<1x32xf32>
    %cst_32 = arith.constant dense<0.000000e+00> : vector<16xf32>
    %45 = vector.multi_reduction <add>, %42, %cst_32 [1] : vector<16x32xf32> to vector<16xf32>
    %46 = vector.shape_cast %45 : vector<16xf32> to vector<16x1xf32>
    %cst_33 = arith.constant 3.200000e+01 : f32
    %47 = vector.broadcast %cst_33 : f32 to vector<16x1xf32>
    %48 = arith.divf %46, %47 : vector<16x1xf32>
    %49 = vector.broadcast %48 : vector<16x1xf32> to vector<16x32xf32>
    %50 = arith.subf %42, %49 : vector<16x32xf32>
    %51 = arith.mulf %50, %50 : vector<16x32xf32>
    %cst_34 = arith.constant dense<0.000000e+00> : vector<16xf32>
    %52 = vector.multi_reduction <add>, %51, %cst_34 [1] : vector<16x32xf32> to vector<16xf32>
    %53 = vector.shape_cast %52 : vector<16xf32> to vector<16x1xf32>
    %cst_35 = arith.constant 3.200000e+01 : f32
    %54 = vector.broadcast %cst_35 : f32 to vector<16x1xf32>
    %55 = arith.divf %53, %54 : vector<16x1xf32>
    %cst_36 = arith.constant 9.99999974E-6 : f32
    %56 = vector.broadcast %cst_36 : f32 to vector<16x1xf32>
    %57 = arith.addf %55, %56 : vector<16x1xf32>
    %58 = math.rsqrt %57 : vector<16x1xf32>
    %59 = vector.broadcast %58 : vector<16x1xf32> to vector<16x32xf32>
    %60 = arith.mulf %50, %59 : vector<16x32xf32>
    %61 = vector.broadcast %43 : vector<1x32xf32> to vector<16x32xf32>
    %62 = arith.mulf %60, %61 : vector<16x32xf32>
    %63 = vector.broadcast %44 : vector<1x32xf32> to vector<16x32xf32>
    %64 = arith.addf %62, %63 : vector<16x32xf32>
    %65 = arith.addf %64, %2 : vector<16x32xf32>
    %c0_37 = arith.constant 0 : index
    %c0_38 = arith.constant 0 : index
    %c0_39 = arith.constant 0 : index
    %66 = vector.load %arg9[%c0_37, %c0_38, %c0_39] : memref<4x32x32xf32, #tpu.memory_space<vmem>>, vector<1x32x32xf32>
    %67 = vector.shape_cast %66 : vector<1x32x32xf32> to vector<32x32xf32>
    %cst_40 = arith.constant dense<0.000000e+00> : vector<16x32xf32>
    %68 = tpu.matmul %65, %67, %cst_40 {dimension_numbers = #tpu.dot_dimension_numbers<[1], [0], [0], [1], [0, 0, 1, 1], [], []>} : vector<16x32xf32>, vector<32x32xf32>, vector<16x32xf32> -> vector<16x32xf32>
    %c0_41 = arith.constant 0 : index
    %c0_42 = arith.constant 0 : index
    %69 = vector.load %arg10[%c0_41, %c0_42] : memref<4x32xf32, #tpu.memory_space<vmem>>, vector<1x32xf32>
    %70 = vector.broadcast %69 : vector<1x32xf32> to vector<16x32xf32>
    %71 = arith.addf %68, %70 : vector<16x32xf32>
    %72 = arith.addf %1, %3 : vector<32x32xf32>
    %c1_43 = arith.constant 1 : index
    %c0_44 = arith.constant 0 : index
    %c0_45 = arith.constant 0 : index
    %73 = vector.load %arg9[%c1_43, %c0_44, %c0_45] : memref<4x32x32xf32, #tpu.memory_space<vmem>>, vector<1x32x32xf32>
    %74 = vector.shape_cast %73 : vector<1x32x32xf32> to vector<32x32xf32>
    %cst_46 = arith.constant dense<0.000000e+00> : vector<32x32xf32>
    %75 = tpu.matmul %72, %74, %cst_46 {dimension_numbers = #tpu.dot_dimension_numbers<[1], [0], [0], [1], [0, 0, 1, 1], [], []>} : vector<32x32xf32>, vector<32x32xf32>, vector<32x32xf32> -> vector<32x32xf32>
    %c1_47 = arith.constant 1 : index
    %c0_48 = arith.constant 0 : index
    %76 = vector.load %arg10[%c1_47, %c0_48] : memref<4x32xf32, #tpu.memory_space<vmem>>, vector<1x32xf32>
    %77 = vector.broadcast %76 : vector<1x32xf32> to vector<32x32xf32>
    %78 = arith.addf %75, %77 : vector<32x32xf32>
    %c2 = arith.constant 2 : index
    %c0_49 = arith.constant 0 : index
    %c0_50 = arith.constant 0 : index
    %79 = vector.load %arg9[%c2, %c0_49, %c0_50] : memref<4x32x32xf32, #tpu.memory_space<vmem>>, vector<1x32x32xf32>
    %80 = vector.shape_cast %79 : vector<1x32x32xf32> to vector<32x32xf32>
    %cst_51 = arith.constant dense<0.000000e+00> : vector<32x32xf32>
    %81 = tpu.matmul %1, %80, %cst_51 {dimension_numbers = #tpu.dot_dimension_numbers<[1], [0], [0], [1], [0, 0, 1, 1], [], []>} : vector<32x32xf32>, vector<32x32xf32>, vector<32x32xf32> -> vector<32x32xf32>
    %c2_52 = arith.constant 2 : index
    %c0_53 = arith.constant 0 : index
    %82 = vector.load %arg10[%c2_52, %c0_53] : memref<4x32xf32, #tpu.memory_space<vmem>>, vector<1x32xf32>
    %83 = vector.broadcast %82 : vector<1x32xf32> to vector<32x32xf32>
    %84 = arith.addf %81, %83 : vector<32x32xf32>
    %c0_54 = arith.constant 0 : index
    %c0_55 = arith.constant 0 : index
    %85 = vector.load %arg18[%c0_54, %c0_55] : memref<128x32xf32, #tpu.memory_space<vmem>>, vector<128x32xf32>
    %c0_56 = arith.constant 0 : index
    %c0_57 = arith.constant 0 : index
    %86 = vector.load %arg19[%c0_56, %c0_57] : memref<16x128xf32, #tpu.memory_space<vmem>>, vector<16x128xf32>
    %87 = tpu.concatenate %78, %78, %78, %78 in 0 : vector<32x32xf32>, vector<32x32xf32>, vector<32x32xf32>, vector<32x32xf32> -> vector<128x32xf32>
    %88 = arith.mulf %87, %85 : vector<128x32xf32>
    %89 = tpu.concatenate %84, %84, %84, %84 in 0 : vector<32x32xf32>, vector<32x32xf32>, vector<32x32xf32>, vector<32x32xf32> -> vector<128x32xf32>
    %90 = arith.mulf %89, %85 : vector<128x32xf32>
    %cst_58 = arith.constant dense<0.000000e+00> : vector<16x128xf32>
    %91 = tpu.matmul %71, %88, %cst_58 {dimension_numbers = #tpu.dot_dimension_numbers<[1], [1], [0], [0], [0, 0, 1, 0], [], []>} : vector<16x32xf32>, vector<128x32xf32>, vector<16x128xf32> -> vector<16x128xf32>
    %cst_59 = arith.constant dense<0xFF800000> : vector<16xf32>
    %92 = vector.multi_reduction <maximumf>, %91, %cst_59 [1] : vector<16x128xf32> to vector<16xf32>
    %93 = vector.shape_cast %92 : vector<16xf32> to vector<16x1xf32>
    %94 = vector.broadcast %93 : vector<16x1xf32> to vector<16x128xf32>
    %95 = arith.subf %91, %94 : vector<16x128xf32>
    %96 = math.exp %95 : vector<16x128xf32>
    %97 = arith.mulf %96, %86 : vector<16x128xf32>
    %cst_60 = arith.constant dense<0.000000e+00> : vector<16x32xf32>
    %98 = tpu.matmul %97, %90, %cst_60 {dimension_numbers = #tpu.dot_dimension_numbers<[1], [0], [0], [1], [0, 0, 1, 1], [], []>} : vector<16x128xf32>, vector<128x32xf32>, vector<16x32xf32> -> vector<16x32xf32>
    %cst_61 = arith.constant dense<0.000000e+00> : vector<16x32xf32>
    %99 = tpu.matmul %97, %85, %cst_61 {dimension_numbers = #tpu.dot_dimension_numbers<[1], [0], [0], [1], [0, 0, 1, 1], [], []>} : vector<16x128xf32>, vector<128x32xf32>, vector<16x32xf32> -> vector<16x32xf32>
    %100 = tpu.reciprocal %99 {approx = true} : vector<16x32xf32> -> vector<16x32xf32>
    %101 = arith.mulf %98, %100 : vector<16x32xf32>
    %c3 = arith.constant 3 : index
    %c0_62 = arith.constant 0 : index
    %c0_63 = arith.constant 0 : index
    %102 = vector.load %arg9[%c3, %c0_62, %c0_63] : memref<4x32x32xf32, #tpu.memory_space<vmem>>, vector<1x32x32xf32>
    %103 = vector.shape_cast %102 : vector<1x32x32xf32> to vector<32x32xf32>
    %cst_64 = arith.constant dense<0.000000e+00> : vector<16x32xf32>
    %104 = tpu.matmul %101, %103, %cst_64 {dimension_numbers = #tpu.dot_dimension_numbers<[1], [0], [0], [1], [0, 0, 1, 1], [], []>} : vector<16x32xf32>, vector<32x32xf32>, vector<16x32xf32> -> vector<16x32xf32>
    %c3_65 = arith.constant 3 : index
    %c0_66 = arith.constant 0 : index
    %105 = vector.load %arg10[%c3_65, %c0_66] : memref<4x32xf32, #tpu.memory_space<vmem>>, vector<1x32xf32>
    %106 = vector.broadcast %105 : vector<1x32xf32> to vector<16x32xf32>
    %107 = arith.addf %104, %106 : vector<16x32xf32>
    %108 = arith.addf %64, %107 : vector<16x32xf32>
    %109 = vector.extract_strided_slice %4 {offsets = [2, 0], sizes = [1, 32], strides = [1, 1]} : vector<6x32xf32> to vector<1x32xf32>
    %110 = vector.extract_strided_slice %4 {offsets = [3, 0], sizes = [1, 32], strides = [1, 1]} : vector<6x32xf32> to vector<1x32xf32>
    %cst_67 = arith.constant dense<0.000000e+00> : vector<16xf32>
    %111 = vector.multi_reduction <add>, %108, %cst_67 [1] : vector<16x32xf32> to vector<16xf32>
    %112 = vector.shape_cast %111 : vector<16xf32> to vector<16x1xf32>
    %cst_68 = arith.constant 3.200000e+01 : f32
    %113 = vector.broadcast %cst_68 : f32 to vector<16x1xf32>
    %114 = arith.divf %112, %113 : vector<16x1xf32>
    %115 = vector.broadcast %114 : vector<16x1xf32> to vector<16x32xf32>
    %116 = arith.subf %108, %115 : vector<16x32xf32>
    %117 = arith.mulf %116, %116 : vector<16x32xf32>
    %cst_69 = arith.constant dense<0.000000e+00> : vector<16xf32>
    %118 = vector.multi_reduction <add>, %117, %cst_69 [1] : vector<16x32xf32> to vector<16xf32>
    %119 = vector.shape_cast %118 : vector<16xf32> to vector<16x1xf32>
    %cst_70 = arith.constant 3.200000e+01 : f32
    %120 = vector.broadcast %cst_70 : f32 to vector<16x1xf32>
    %121 = arith.divf %119, %120 : vector<16x1xf32>
    %cst_71 = arith.constant 9.99999974E-6 : f32
    %122 = vector.broadcast %cst_71 : f32 to vector<16x1xf32>
    %123 = arith.addf %121, %122 : vector<16x1xf32>
    %124 = math.rsqrt %123 : vector<16x1xf32>
    %125 = vector.broadcast %124 : vector<16x1xf32> to vector<16x32xf32>
    %126 = arith.mulf %116, %125 : vector<16x32xf32>
    %127 = vector.broadcast %109 : vector<1x32xf32> to vector<16x32xf32>
    %128 = arith.mulf %126, %127 : vector<16x32xf32>
    %129 = vector.broadcast %110 : vector<1x32xf32> to vector<16x32xf32>
    %130 = arith.addf %128, %129 : vector<16x32xf32>
    %c0_72 = arith.constant 0 : index
    %c0_73 = arith.constant 0 : index
    %131 = vector.load %arg11[%c0_72, %c0_73] : memref<32x64xf32, #tpu.memory_space<vmem>>, vector<32x64xf32>
    %cst_74 = arith.constant dense<0.000000e+00> : vector<16x64xf32>
    %132 = tpu.matmul %130, %131, %cst_74 {dimension_numbers = #tpu.dot_dimension_numbers<[1], [0], [0], [1], [0, 0, 1, 1], [], []>} : vector<16x32xf32>, vector<32x64xf32>, vector<16x64xf32> -> vector<16x64xf32>
    %c0_75 = arith.constant 0 : index
    %c0_76 = arith.constant 0 : index
    %133 = vector.load %arg12[%c0_75, %c0_76] : memref<1x64xf32, #tpu.memory_space<vmem>>, vector<1x64xf32>
    %134 = vector.broadcast %133 : vector<1x64xf32> to vector<16x64xf32>
    %135 = arith.addf %132, %134 : vector<16x64xf32>
    %cst_77 = arith.constant 0.000000e+00 : f32
    %136 = vector.broadcast %cst_77 : f32 to vector<16x64xf32>
    %137 = arith.maximumf %135, %136 : vector<16x64xf32>
    %c0_78 = arith.constant 0 : index
    %c0_79 = arith.constant 0 : index
    %138 = vector.load %arg13[%c0_78, %c0_79] : memref<64x32xf32, #tpu.memory_space<vmem>>, vector<64x32xf32>
    %cst_80 = arith.constant dense<0.000000e+00> : vector<16x32xf32>
    %139 = tpu.matmul %137, %138, %cst_80 {dimension_numbers = #tpu.dot_dimension_numbers<[1], [0], [0], [1], [0, 0, 1, 1], [], []>} : vector<16x64xf32>, vector<64x32xf32>, vector<16x32xf32> -> vector<16x32xf32>
    %c0_81 = arith.constant 0 : index
    %c0_82 = arith.constant 0 : index
    %140 = vector.load %arg14[%c0_81, %c0_82] : memref<1x32xf32, #tpu.memory_space<vmem>>, vector<1x32xf32>
    %141 = vector.broadcast %140 : vector<1x32xf32> to vector<16x32xf32>
    %142 = arith.addf %139, %141 : vector<16x32xf32>
    %143 = arith.addf %130, %142 : vector<16x32xf32>
    %144 = vector.extract_strided_slice %4 {offsets = [4, 0], sizes = [1, 32], strides = [1, 1]} : vector<6x32xf32> to vector<1x32xf32>
    %145 = vector.extract_strided_slice %4 {offsets = [5, 0], sizes = [1, 32], strides = [1, 1]} : vector<6x32xf32> to vector<1x32xf32>
    %cst_83 = arith.constant dense<0.000000e+00> : vector<16xf32>
    %146 = vector.multi_reduction <add>, %143, %cst_83 [1] : vector<16x32xf32> to vector<16xf32>
    %147 = vector.shape_cast %146 : vector<16xf32> to vector<16x1xf32>
    %cst_84 = arith.constant 3.200000e+01 : f32
    %148 = vector.broadcast %cst_84 : f32 to vector<16x1xf32>
    %149 = arith.divf %147, %148 : vector<16x1xf32>
    %150 = vector.broadcast %149 : vector<16x1xf32> to vector<16x32xf32>
    %151 = arith.subf %143, %150 : vector<16x32xf32>
    %152 = arith.mulf %151, %151 : vector<16x32xf32>
    %cst_85 = arith.constant dense<0.000000e+00> : vector<16xf32>
    %153 = vector.multi_reduction <add>, %152, %cst_85 [1] : vector<16x32xf32> to vector<16xf32>
    %154 = vector.shape_cast %153 : vector<16xf32> to vector<16x1xf32>
    %cst_86 = arith.constant 3.200000e+01 : f32
    %155 = vector.broadcast %cst_86 : f32 to vector<16x1xf32>
    %156 = arith.divf %154, %155 : vector<16x1xf32>
    %cst_87 = arith.constant 9.99999974E-6 : f32
    %157 = vector.broadcast %cst_87 : f32 to vector<16x1xf32>
    %158 = arith.addf %156, %157 : vector<16x1xf32>
    %159 = math.rsqrt %158 : vector<16x1xf32>
    %160 = vector.broadcast %159 : vector<16x1xf32> to vector<16x32xf32>
    %161 = arith.mulf %151, %160 : vector<16x32xf32>
    %162 = vector.broadcast %144 : vector<1x32xf32> to vector<16x32xf32>
    %163 = arith.mulf %161, %162 : vector<16x32xf32>
    %164 = vector.broadcast %145 : vector<1x32xf32> to vector<16x32xf32>
    %165 = arith.addf %163, %164 : vector<16x32xf32>
    %c0_88 = arith.constant 0 : index
    %c0_89 = arith.constant 0 : index
    %166 = vector.load %arg20[%c0_88, %c0_89] : memref<16x32xf32, #tpu.memory_space<vmem>>, vector<16x32xf32>
    tpu.vector_store %arg20[%c0_88, %c0_89], %165 {strides = array<i32>} : memref<16x32xf32, #tpu.memory_space<vmem>>, vector<16x32xf32>,
    return
  }
  func.func @transform_0(%arg0: i32) -> (i32, i32) {
    %c0_i32 = arith.constant 0 : i32
    %c0_i32_0 = arith.constant 0 : i32
    %c0_i32_1 = arith.constant 0 : i32
    return %c0_i32, %c0_i32_0 : i32, i32
  }
  func.func @transform_1(%arg0: i32) -> (i32, i32) {
    %c0_i32 = arith.constant 0 : i32
    %c0_i32_0 = arith.constant 0 : i32
    %c0_i32_1 = arith.constant 0 : i32
    return %c0_i32, %c0_i32_0 : i32, i32
  }
  func.func @transform_2(%arg0: i32) -> (i32, i32) {
    %c0_i32 = arith.constant 0 : i32
    %c0_i32_0 = arith.constant 0 : i32
    %c0_i32_1 = arith.constant 0 : i32
    return %c0_i32, %c0_i32_0 : i32, i32
  }
  func.func @transform_3(%arg0: i32) -> (i32, i32) {
    %c0_i32 = arith.constant 0 : i32
    %c0_i32_0 = arith.constant 0 : i32
    %c0_i32_1 = arith.constant 0 : i32
    return %c0_i32, %c0_i32_0 : i32, i32
  }
  func.func @transform_4(%arg0: i32) -> (i32, i32) {
    %c0_i32 = arith.constant 0 : i32
    %c0_i32_0 = arith.constant 0 : i32
    %c0_i32_1 = arith.constant 0 : i32
    return %c0_i32, %c0_i32_0 : i32, i32
  }
  func.func @transform_5(%arg0: i32) -> (i32, i32) {
    %c0_i32 = arith.constant 0 : i32
    %c0_i32_0 = arith.constant 0 : i32
    %c0_i32_1 = arith.constant 0 : i32
    return %c0_i32, %c0_i32_0 : i32, i32
  }
  func.func @transform_6(%arg0: i32) -> (i32, i32, i32) {
    %c0_i32 = arith.constant 0 : i32
    %c0_i32_0 = arith.constant 0 : i32
    %c0_i32_1 = arith.constant 0 : i32
    %c0_i32_2 = arith.constant 0 : i32
    return %c0_i32, %c0_i32_0, %c0_i32_1 : i32, i32, i32
  }
  func.func @transform_7(%arg0: i32) -> (i32, i32) {
    %c0_i32 = arith.constant 0 : i32
    %c0_i32_0 = arith.constant 0 : i32
    %c0_i32_1 = arith.constant 0 : i32
    return %c0_i32, %c0_i32_0 : i32, i32
  }
  func.func @transform_8(%arg0: i32) -> (i32, i32, i32) {
    %c0_i32 = arith.constant 0 : i32
    %c0_i32_0 = arith.constant 0 : i32
    %c0_i32_1 = arith.constant 0 : i32
    %c0_i32_2 = arith.constant 0 : i32
    return %c0_i32, %c0_i32_0, %c0_i32_1 : i32, i32, i32
  }
  func.func @transform_9(%arg0: i32) -> (i32, i32) {
    %c0_i32 = arith.constant 0 : i32
    %c0_i32_0 = arith.constant 0 : i32
    %c0_i32_1 = arith.constant 0 : i32
    return %c0_i32, %c0_i32_0 : i32, i32
  }
  func.func @transform_10(%arg0: i32) -> (i32, i32) {
    %c0_i32 = arith.constant 0 : i32
    %c0_i32_0 = arith.constant 0 : i32
    %c0_i32_1 = arith.constant 0 : i32
    return %c0_i32, %c0_i32_0 : i32, i32
  }
  func.func @transform_11(%arg0: i32) -> (i32, i32) {
    %c0_i32 = arith.constant 0 : i32
    %c0_i32_0 = arith.constant 0 : i32
    %c0_i32_1 = arith.constant 0 : i32
    return %c0_i32, %c0_i32_0 : i32, i32
  }
  func.func @transform_12(%arg0: i32) -> (i32, i32) {
    %c0_i32 = arith.constant 0 : i32
    %c0_i32_0 = arith.constant 0 : i32
    %c0_i32_1 = arith.constant 0 : i32
    return %c0_i32, %c0_i32_0 : i32, i32
  }
  func.func @transform_13(%arg0: i32) -> (i32, i32) {
    %c0_i32 = arith.constant 0 : i32
    %c0_i32_0 = arith.constant 0 : i32
    %c0_i32_1 = arith.constant 0 : i32
    return %c0_i32, %c0_i32_0 : i32, i32
  }
  func.func @transform_14(%arg0: i32) -> (i32, i32) {
    %c0_i32 = arith.constant 0 : i32
    %c0_i32_0 = arith.constant 0 : i32
    %c0_i32_1 = arith.constant 0 : i32
    return %c0_i32, %c0_i32_0 : i32, i32
  }
  func.func @transform_15(%arg0: i32) -> (i32, i32) {
    %c0_i32 = arith.constant 0 : i32
    %c0_i32_0 = arith.constant 0 : i32
    %c0_i32_1 = arith.constant 0 : i32
    return %c0_i32, %c0_i32_0 : i32, i32
  }
  func.func @transform_16(%arg0: i32) -> (i32, i32) {
    %c0_i32 = arith.constant 0 : i32
    %c0_i32_0 = arith.constant 0 : i32
    %c0_i32_1 = arith.constant 0 : i32
    return %c0_i32, %c0_i32_0 : i32, i32
  }
  func.func @transform_17(%arg0: i32) -> (i32, i32) {
    %c0_i32 = arith.constant 0 : i32
    %c0_i32_0 = arith.constant 0 : i32
    %c0_i32_1 = arith.constant 0 : i32
    return %c0_i32, %c0_i32_0 : i32, i32
  }
  func.func @transform_18(%arg0: i32) -> (i32, i32) {
    %c0_i32 = arith.constant 0 : i32
    %c0_i32_0 = arith.constant 0 : i32
    %c0_i32_1 = arith.constant 0 : i32
    return %c0_i32, %c0_i32_0 : i32, i32
  }
  func.func @transform_19(%arg0: i32) -> (i32, i32) {
    %c0_i32 = arith.constant 0 : i32
    %c0_i32_0 = arith.constant 0 : i32
    %c0_i32_1 = arith.constant 0 : i32
    return %c0_i32, %c0_i32_0 : i32, i32
  }
}

</mosaic_0001>

<bundles_post_ra>
// kernel: tpu_custom_call.1
= control target key start
LH: loop header
LB: loop body
LE: loop exit
PB: predicated region body
PF: predicated region fallthrough
CT: control target
= control target key end

     0   :  { %s3667_s0 = inlined_call_operand.hbm [shape: f32[16,32], index: 0, kind: input, shape index: {}]   ;;  %s3668_s1 = inlined_call_operand.vmem [shape: f32[32,32], index: 1, kind: input, shape index: {}]   ;;  %s3669_s2 = inlined_call_operand.hbm [shape: f32[16,32], index: 2, kind: input, shape index: {}]   ;;  %s3670_s3 = inlined_call_operand.vmem [shape: f32[32,32], index: 3, kind: input, shape index: {}]   ;;  %s3671_s4 = inlined_call_operand.vmem [shape: f32[32,64], index: 4, kind: input, shape index: {}]   ;;  %s3672_s5 = inlined_call_operand.hbm [shape: f32[1,64], index: 5, kind: input, shape index: {}]   ;;  %s3673_s6 = inlined_call_operand.vmem [shape: f32[2,32,32], index: 6, kind: input, shape index: {}]   ;;  %s3674_s7 = inlined_call_operand.hbm [shape: f32[2,32], index: 7, kind: input, shape index: {}]   ;;  %s3675_s8 = inlined_call_operand.vmem [shape: f32[4,32,32], index: 8, kind: input, shape index: {}]   ;;  %s3676_s9 = inlined_call_operand.vmem [shape: f32[4,32], index: 9, kind: input, shape index: {}]   ;;  %s3677_s10 = inlined_call_operand.hbm [shape: f32[32,64], index: 10, kind: input, shape index: {}]   ;;  %s3678_s11 = inlined_call_operand.hbm [shape: f32[1,64], index: 11, kind: input, shape index: {}]   ;;  %s3679_s12 = inlined_call_operand.vmem [shape: f32[64,32], index: 12, kind: input, shape index: {}]   ;;  %s3680_s13 = inlined_call_operand.hbm [shape: f32[1,32], index: 13, kind: input, shape index: {}]   ;;  %s3681_s14 = inlined_call_operand.hbm [shape: f32[6,32], index: 14, kind: input, shape index: {}]   ;;  %s3682_s15 = inlined_call_operand.vmem [shape: f32[64,32], index: 15, kind: input, shape index: {}]   ;;  %s3683_s16 = inlined_call_operand.vmem [shape: f32[16,64], index: 16, kind: input, shape index: {}]   ;;  %s3684_s17 = inlined_call_operand.vmem [shape: f32[128,32], index: 17, kind: input, shape index: {}]   ;;  %s3685_s18 = inlined_call_operand.vmem [shape: f32[16,128], index: 18, kind: input, shape index: {}]   ;;  %s3686_s19 = inlined_call_operand.hbm [shape: f32[16,32], index: 19, kind: output, shape index: {}]  }
   0x1   :  { %3693 = sst [smem:[#allocation23_spill]] %s3667_s0 }
   0x2   :  { %3694 = sst [smem:[#allocation24_spill]] %s3668_s1 }
   0x3   :  { %3695 = sst [smem:[#allocation25_spill]] %s3669_s2 }
   0x4   :  { %3696 = sst [smem:[#allocation26_spill]] %s3670_s3 }
   0x5   :  { %24 = vsyncpa [#allocation3], 0 }
   0x6   :  { %25 = vsyncpa [#allocation6], 0 }
   0x7   :  { %26 = vsyncpa [#allocation9], 0 }
   0x8   :  { %27 = vsyncpa [#allocation12], 0 }
   0x9   :  { %28 = vsyncpa [#allocation15], 0 }
   0xa   :  { %29 = vsyncpa [#allocation4], 0  ;;  %s2904_s0 = smov [#allocation5]   ;;  %s2905_s20 = smov [#allocation8]  }
   0xb   :  { %s49_s30 = sshll.u32 %s2904_s0, 4  ;;  %s78_s21 = sshll.u32 %s2905_s20, 4  ;;  %s50_s30 = int_to_ptr.vmem [resolvable:$true] %s49_s30  ;;  %s79_s21 = int_to_ptr.vmem [resolvable:$true] %s78_s21 }
   0xc   :  { %s3697_s2 = sld [smem:[#allocation25_spill]] }
  0x12   :  { %s2694_s23 = scalar_lea.hbm %s3697_s2, 256 }
  0x13   :  { %p2695_p0 = scmp.ne.s32.totalorder %s3697_s2, %s2694_s23  ;;  %p2698_p1 = scmp.lt.u32.totalorder %s2694_s23, %s3697_s2 }
  0x15   :  { %p2700_p2 = pnand %p2698_p1, %p2695_p0 }
  0x17   :  { %2703 = shalt.err (!%p2700_p2)
}
  0x18   :  { %s2704_s27 = scalar_lea.vmem %s50_s30, 256  ;;  %p2709_p4 = scmp.lt.s32.totalorder %s50_s30, %s50_s30 }
  0x19   :  { %p2705_p3 = scmp.ne.s32.totalorder %s50_s30, %s2704_s27  ;;  %p2710_p5 = scmp.lt.s32.totalorder %s2704_s27, %s2704_s27 }
  0x1b   :  { %p2711_p6 = por %p2710_p5, %p2709_p4 }
  0x1d   :  { %p2712_p7 = pnand %p2711_p6, %p2705_p3 }
  0x1f   :  { %2715 = shalt.err (!%p2712_p7)
}
  0x20   :  { %s3691_s28 = smov 128   ;;  %s2907_s29 = smov 8  }
  0x21   :  { %55 = dma.hbm_to_vmem [thread:$0]  %s3697_s2, 256, %s50_s30, [#allocation6], %s3691_s28, %s3691_s28, %s2907_s29  }
  0x22   :  { %s2716_s23 = scalar_lea.hbm %s3674_s7, 32 }
  0x23   :  { %p2717_p8 = scmp.ne.s32.totalorder %s3674_s7, %s2716_s23  ;;  %p2720_p9 = scmp.lt.u32.totalorder %s2716_s23, %s3674_s7 }
  0x25   :  { %p2722_p10 = pnand %p2720_p9, %p2717_p8 }
  0x27   :  { %2725 = shalt.err (!%p2722_p10)
}
  0x28   :  { %s2726_s27 = scalar_lea.vmem %s79_s21, 32  ;;  %p2731_p12 = scmp.lt.s32.totalorder %s79_s21, %s79_s21 }
  0x29   :  { %p2727_p11 = scmp.ne.s32.totalorder %s79_s21, %s2726_s27  ;;  %p2732_p13 = scmp.lt.s32.totalorder %s2726_s27, %s2726_s27 }
  0x2b   :  { %p2733_p0 = por %p2732_p13, %p2731_p12 }
  0x2d   :  { %p2734_p1 = pnand %p2733_p0, %p2727_p11 }
  0x2f   :  { %2737 = shalt.err (!%p2734_p1)
}
  0x30   :  { %81 = dma.hbm_to_vmem [thread:$0]  %s3674_s7, 32, %s79_s21, [#allocation9]  }
  0x31   :  { %s2908_s0 = smov [#allocation11]   ;;  %s2909_s1 = smov [#allocation2]  }
  0x32   :  { %s104_s20 = sshll.u32 %s2908_s0, 4  ;;  %s35_s22 = sshll.u32 %s2909_s1, 4  ;;  %s105_s20 = int_to_ptr.vmem [resolvable:$true] %s104_s20  ;;  %s3044_s22 = int_to_ptr.vmem [resolvable:$true] %s35_s22 }
  0x33   :  { %s2738_s25 = scalar_lea.hbm %s3678_s11, 16 }
  0x34   :  { %p2739_p2 = scmp.ne.s32.totalorder %s3678_s11, %s2738_s25  ;;  %p2742_p3 = scmp.lt.u32.totalorder %s2738_s25, %s3678_s11 }
  0x36   :  { %p2744_p4 = pnand %p2742_p3, %p2739_p2 }
  0x38   :  { %2747 = shalt.err (!%p2744_p4)
}
  0x39   :  { %s2748_s7 = scalar_lea.vmem %s105_s20, 16  ;;  %s2752_s21 = scalar_lea.vmem %s105_s20, 32 }
  0x3a   :  { %p2749_p5 = scmp.ne.s32.totalorder %s105_s20, %s2748_s7  ;;  %p2753_p6 = scmp.lt.s32.totalorder %s105_s20, %s105_s20 }
  0x3b   :  { %p2754_p7 = scmp.lt.s32.totalorder %s2752_s21, %s2748_s7 }
  0x3d   :  { %p2755_p8 = por %p2754_p7, %p2753_p6 }
  0x3f   :  { %p2756_p9 = pnand %p2755_p8, %p2749_p5 }
  0x41   :  { %2759 = shalt.err (!%p2756_p9)
}
  0x42   :  { %107 = dma.hbm_to_vmem [thread:$0]  %s3678_s11, 16, %s105_s20, [#allocation12]  }
  0x43   :  { %s3698_s23 = sld [smem:[#allocation23_spill]] }
  0x49   :  { %s2760_s24 = scalar_lea.hbm %s3698_s23, 256 }
  0x4a   :  { %p2761_p10 = scmp.ne.s32.totalorder %s3698_s23, %s2760_s24  ;;  %p2764_p11 = scmp.lt.u32.totalorder %s2760_s24, %s3698_s23 }
  0x4c   :  { %p2766_p12 = pnand %p2764_p11, %p2761_p10 }
  0x4e   :  { %2769 = shalt.err (!%p2766_p12)
}
  0x4f   :  { %s2770_s27 = scalar_lea.vmem %s3044_s22, 256  ;;  %p2775_p0 = scmp.lt.s32.totalorder %s3044_s22, %s3044_s22 }
  0x50   :  { %p2771_p13 = scmp.ne.s32.totalorder %s3044_s22, %s2770_s27  ;;  %p2776_p1 = scmp.lt.s32.totalorder %s2770_s27, %s2770_s27 }
  0x52   :  { %p2777_p2 = por %p2776_p1, %p2775_p0 }
  0x54   :  { %p2778_p3 = pnand %p2777_p2, %p2771_p13 }
  0x56   :  { %2781 = shalt.err (!%p2778_p3)
}
  0x57   :  { %s3699_s11 = smov 128   ;;  %s2910_s21 = smov [#allocation7]  }
  0x58   :  { %41 = dma.hbm_to_vmem [thread:$0]  %s3698_s23, 256, %s3044_s22, [#allocation3], %s3699_s11, %s3699_s11, %s2907_s29  }
  0x59   :  { %s66_s30 = sshll.u32 %s2910_s21, 4  ;;  %s2911_s2 = smov [#allocation10]   ;;  %s67_s30 = int_to_ptr.vmem [resolvable:$true] %s66_s30 }
  0x5a   :  { %s91_s0 = sshll.u32 %s2911_s2, 4  ;;  %s2782_s28 = scalar_lea.hbm %s3672_s5, 16  ;;  %s3078_s0 = int_to_ptr.vmem [resolvable:$true] %s91_s0 }
  0x5b   :  { %p2783_p4 = scmp.ne.s32.totalorder %s3672_s5, %s2782_s28  ;;  %p2786_p5 = scmp.lt.u32.totalorder %s2782_s28, %s3672_s5 }
  0x5d   :  { %p2788_p6 = pnand %p2786_p5, %p2783_p4 }
  0x5f   :  { %2791 = shalt.err (!%p2788_p6)
}
  0x60   :  { %s2792_s22 = scalar_lea.vmem %s67_s30, 16  ;;  %s2796_s23 = scalar_lea.vmem %s67_s30, 32 }
  0x61   :  { %p2793_p7 = scmp.ne.s32.totalorder %s67_s30, %s2792_s22  ;;  %p2797_p8 = scmp.lt.s32.totalorder %s67_s30, %s67_s30 }
  0x62   :  { %p2798_p9 = scmp.lt.s32.totalorder %s2796_s23, %s2792_s22 }
  0x64   :  { %p2799_p10 = por %p2798_p9, %p2797_p8 }
  0x66   :  { %p2800_p11 = pnand %p2799_p10, %p2793_p7 }
  0x68   :  { %2803 = shalt.err (!%p2800_p11)
}
  0x69   :  { %69 = dma.hbm_to_vmem [thread:$0]  %s3672_s5, 16, %s67_s30, [#allocation6]  }
  0x6a   :  { %s2804_s1 = scalar_lea.hbm %s3677_s10, 512 }
  0x6b   :  { %p2805_p12 = scmp.ne.s32.totalorder %s3677_s10, %s2804_s1  ;;  %p2808_p13 = scmp.lt.u32.totalorder %s2804_s1, %s3677_s10 }
  0x6d   :  { %p2810_p0 = pnand %p2808_p13, %p2805_p12 }
  0x6f   :  { %2813 = shalt.err (!%p2810_p0)
}
  0x70   :  { %s2814_s26 = scalar_lea.vmem %s3078_s0, 512  ;;  %p2819_p2 = scmp.lt.s32.totalorder %s3078_s0, %s3078_s0 }
  0x71   :  { %p2815_p1 = scmp.ne.s32.totalorder %s3078_s0, %s2814_s26  ;;  %p2820_p3 = scmp.lt.s32.totalorder %s2814_s26, %s2814_s26 }
  0x73   :  { %p2821_p4 = por %p2820_p3, %p2819_p2 }
  0x75   :  { %p2822_p5 = pnand %p2821_p4, %p2815_p1 }
  0x77   :  { %2825 = shalt.err (!%p2822_p5)
}
  0x78   :  { %97 = dma.hbm_to_vmem [thread:$0]  %s3677_s10, 512, %s3078_s0, [#allocation9], %s3699_s11, %s3699_s11, %s2907_s29  }
  0x79   :  { %s2912_s27 = smov [#allocation13]   ;;  %s2913_s23 = smov [#allocation14]  }
  0x7a   :  { %s116_s22 = sshll.u32 %s2912_s27, 4  ;;  %s126_s20 = sshll.u32 %s2913_s23, 4  ;;  %s117_s22 = int_to_ptr.vmem [resolvable:$true] %s116_s22  ;;  %s127_s20 = int_to_ptr.vmem [resolvable:$true] %s126_s20 }
  0x7b   :  { %s2826_s2 = scalar_lea.hbm %s3680_s13, 16 }
  0x7c   :  { %p2827_p6 = scmp.ne.s32.totalorder %s3680_s13, %s2826_s2  ;;  %p2830_p7 = scmp.lt.u32.totalorder %s2826_s2, %s3680_s13 }
  0x7e   :  { %p2832_p8 = pnand %p2830_p7, %p2827_p6 }
  0x80   :  { %2835 = shalt.err (!%p2832_p8)
}
  0x81   :  { %s2836_s10 = scalar_lea.vmem %s117_s22, 16  ;;  %s2840_s0 = scalar_lea.vmem %s117_s22, 32 }
  0x82   :  { %p2837_p9 = scmp.ne.s32.totalorder %s117_s22, %s2836_s10  ;;  %p2841_p10 = scmp.lt.s32.totalorder %s117_s22, %s117_s22 }
  0x83   :  { %p2842_p11 = scmp.lt.s32.totalorder %s2840_s0, %s2836_s10 }
  0x85   :  { %p2843_p12 = por %p2842_p11, %p2841_p10 }
  0x87   :  { %p2844_p13 = pnand %p2843_p12, %p2837_p9 }
  0x89   :  { %2847 = shalt.err (!%p2844_p13)
}
  0x8a   :  { %119 = dma.hbm_to_vmem [thread:$0]  %s3680_s13, 16, %s117_s22, [#allocation12]  }
  0x8b   :  { %s2848_s27 = scalar_lea.hbm %s3681_s14, 128 }
  0x8c   :  { %p2849_p0 = scmp.ne.s32.totalorder %s3681_s14, %s2848_s27  ;;  %p2852_p1 = scmp.lt.u32.totalorder %s2848_s27, %s3681_s14 }
  0x8e   :  { %p2854_p2 = pnand %p2852_p1, %p2849_p0 }
  0x90   :  { %2857 = shalt.err (!%p2854_p2)
}
  0x91   :  { %s2858_s1 = scalar_lea.vmem %s127_s20, 128  ;;  %p2863_p4 = scmp.lt.s32.totalorder %s127_s20, %s127_s20 }
  0x92   :  { %p2859_p3 = scmp.ne.s32.totalorder %s127_s20, %s2858_s1  ;;  %p2864_p5 = scmp.lt.s32.totalorder %s2858_s1, %s2858_s1 }
  0x94   :  { %p2865_p6 = por %p2864_p5, %p2863_p4 }
  0x96   :  { %p2866_p7 = pnand %p2865_p6, %p2859_p3 }
  0x98   :  { %2869 = shalt.err (!%p2866_p7)
}
  0x99   :  { %129 = dma.hbm_to_vmem [thread:$0]  %s3681_s14, 128, %s127_s20, [#allocation15]  }
  0x9a   :  { %2892 = dma.done.wait [#allocation3], 256  }
  0x9b   :  { %2893 = vsyncadd [#allocation3], 4294967040 }
  0x9c   :  { %2894 = dma.done.wait [#allocation6], 272  }
  0x9d   :  { %2895 = vsyncadd [#allocation6], 4294967024 }
  0x9e   :  { %2896 = dma.done.wait [#allocation9], 544  }
  0x9f   :  { %2897 = vsyncadd [#allocation9], 4294966752 }
  0xa0   :  { %2898 = dma.done.wait [#allocation12], 32  }
  0xa1   :  { %2899 = vsyncadd [#allocation12], 4294967264 }
  0xa2   :  { %2900 = dma.done.wait [#allocation15], 128  }
  0xa3   :  { %2901 = vsyncadd [#allocation15], 4294967168  ;;  %v177_v0 = vld [vmem:[%s3671_s4] sm:$0xff]  ;;  %v178_v1 = vld [vmem:[%s3671_s4 + $0x8] sm:$0xff]  ;;  %vm188_vm0 = vcmask 261120   ;;  %s2914_s30 = smov 32  }
  0xa4   :  { %v179_v2 = vld [vmem:[%s3671_s4 + $0x10] sm:$0xff]  ;;  %v2385_v3 = vpack.c.bf16 %v178_v1, %v177_v0  ;;  %v180_v4 = vld [vmem:[%s3671_s4 + $0x18] sm:$0xff]  ;;  %v3148_v5 = vld [vmem:[#allocation2] sm:$0xff]  ;;  %vm539_vm2 = vcmask 523264   ;;  %s3702_s4 = sld [smem:[#allocation24_spill]]  ;;  %s3703_s21 = sld [smem:[#allocation26_spill]] }
  0xa5   :  { %v3150_v6 = vld [vmem:[#allocation5] sm:$0xff]  ;;  %v2389_v7 = vpack.c.bf16 %v180_v4, %v179_v2  ;;  %v3163_v10 = vld [vmem:[%s3682_s15] sm:$0xff]  ;;  %v3166_v11 = vld [vmem:[#allocation2 + $0x8] sm:$0xff] }
  0xa6   :  { %v175_v8 = vadd.f32 %v3150_v6, %v3148_v5  ;;  %v3157_v9 = vld [vmem:[%s3682_s15 + $0x10] sm:$0xff]  ;;  %2386 = vmatprep.subr.bf16.mxu1 %v2385_v3  ;;  %v3168_v12 = vld [vmem:[#allocation5 + $0x8] sm:$0xff]  ;;  %378 = vrot.lane.b32.xlu0 %v3163_v10, %s2914_s30  ;;  %v3179_v14 = vld [vmem:[%s3682_s15 + $0x8] sm:$0xff] }
  0xa7   :  { %382 = vrot.lane.b32.xlu1 %v3157_v9, %s2914_s30  ;;  %2388 = vmatpush3.bf16.msra.mxu1 %v2385_v3  ;;  %v3173_v13 = vld [vmem:[%s3682_s15 + $0x18] sm:$0xff]  ;;  %v176_v15 = vadd.f32 %v3168_v12, %v3166_v11  ;;  %v3187_v16 = vld [vmem:[%s3682_s15 + $0x28] sm:$0xff]  ;;  %v3193_v17 = vld [vmem:[%s3682_s15 + $0x20] sm:$0xff] }
  0xa8   :  { %2118 = vmatprep.mubr.msk.f32.mxu1 %vm188_vm0, %v175_v8  ;;  %2390 = vmatprep.subr.bf16.mxu1 %v2389_v7  ;;  %v3200_v18 = vld [vmem:[%s3682_s15 + $0x38] sm:$0xff]  ;;  %v3208_v19 = vld [vmem:[%s3682_s15 + $0x30] sm:$0xff]  ;;  %v1885_v26 = vld [vmem:[#allocation7] ss:$0 sm:$0xff]  ;;  %s2915_s15 = smov 96  }
  0xa9   :  { %v270_v45 = vld [vmem:[%s3673_s6] sm:$0xff]  ;;  %v271_v46 = vld [vmem:[%s3673_s6 + $0x8] sm:$0xff]  ;;  %v272_v47 = vld [vmem:[%s3673_s6 + $0x10] sm:$0xff] }
  0xaa   :  { %380 = vrot.lane.b32.xlu0 %v3179_v14, %s2914_s30  ;;  %v2393_v48 = vpack.c.bf16 %v271_v46, %v270_v45  ;;  %v273_v49 = vld [vmem:[%s3673_s6 + $0x18] sm:$0xff]  ;;  %vm3229_vm1 = vmpackc.low %vm188_vm0, %vm188_vm0  ;;  %v1888_v4 = vld [vmem:[#allocation8] ss:$0 sm:$0xff] }
  0xab   :  { %384 = vrot.lane.b32.xlu1 %v3173_v13, %s2914_s30  ;;  %2392 = vmatpush3.bf16.msra.mxu1 %v2389_v7  ;;  %v2397_v50 = vpack.c.bf16 %v273_v49, %v272_v47  ;;  %v369_v46 = vld [vmem:[%s3683_s16 + $0x8] sm:$0xff]  ;;  %v2449_v49 = vpack.c.bf16 %v3187_v16, %v3193_v17  ;;  %v1926_v57 = vld [vmem:[%s3675_s8 + $0x50] sm:$0xff] }
  0xac   :  { %2394 = vmatprep.subr.bf16.mxu1 %v2393_v48 }
  0xae   :  { %2119 = vmatmul.mubr.msk.f32.vlgmr.msra.gmra.mrb[0].mxu1 %vm188_vm0, %v176_v15  ;;  %386 = vrot.lane.b32.xlu0 %v3193_v17, %s2914_s30 }
  0xaf   :  { %388 = vrot.lane.b32.xlu1 %v3187_v16, %s2914_s30  ;;  %2129 = vmatprep.mubr.msk.f32.mxu1 %vm188_vm0, %v3148_v5 }
  0xb0   :  { %2396 = vmatpush3.bf16.msra.mxu1 %v2393_v48  ;;  %v2445_v48 = vpack.c.bf16 %v3173_v13, %v3157_v9 }
  0xb1   :  { %2398 = vmatprep.subr.bf16.mxu1 %v2397_v50 }
  0xb2   :  { %390 = vrot.lane.b32.xlu0 %v3208_v19, %s2914_s30 }
  0xb3   :  { %392 = vrot.lane.b32.xlu1 %v3200_v18, %s2914_s30 }
  0xb4   :  { %2400 = vmatpush3.bf16.msra.mxu1 %v2397_v50  ;;  %v2453_v50 = vpack.c.bf16 %v3200_v18, %v3208_v19 }
  0xb7   :  { %2130 = vmatmul.mubr.msk.f32.vlgmr.msra.gmra.mrb[2].mxu1 %vm188_vm0, %v3166_v11 }
 0x118   :  { %v379_v21 = vpop.permute.xlu0 %378 }
 0x119   :  { %v383_v20 = vpop.permute.xlu1 %382 }
 0x11c   :  { %v381_v23 = vpop.permute.xlu0 %380 }
 0x11d   :  { %v385_v22 = vpop.permute.xlu1 %384 }
 0x120   :  { %v387_v25 = vpop.permute.xlu0 %386 }
 0x121   :  { %v389_v24 = vpop.permute.xlu1 %388 }
 0x124   :  { %v391_v32 = vpop.permute.xlu0 %390 }
 0x125   :  { %v393_v31 = vpop.permute.xlu1 %392 }
 0x181   :  { %v2120_v27 = vpop.f32.mrb[0].mxu1 }
 0x182   :  { %v267_v28 = vadd.f32 %v2120_v27, %v1885_v26  ;;  %v261_v29 = vpop.f32.mrb[1].mxu1 }
 0x183   :  { %v262_v30 = vadd.f32 %v1885_v26, %v261_v29 }
 0x184   :  { %v405_v33 = vmul.f32 %v385_v22, %v267_v28  ;;  %v403_v34 = vmul.f32 %v381_v23, %v267_v28  ;;  %v409_v37 = vmul.f32 %v393_v31, %v267_v28  ;;  %v407_v38 = vmul.f32 %v389_v24, %v267_v28 }
 0x185   :  { %2148 = vmatprep.mubr.msk.f32.mxu0 %vm188_vm0, %v262_v30  ;;  %v404_v35 = vmul.f32 %v383_v20, %v262_v30  ;;  %v402_v36 = vmul.f32 %v379_v21, %v262_v30  ;;  %v408_v39 = vmul.f32 %v391_v32, %v262_v30  ;;  %v406_v42 = vmul.f32 %v387_v25, %v262_v30 }
 0x187   :  { %v2651_v40 = vpack.i.bf16 %v405_v33, %v404_v35  ;;  %v2646_v41 = vpack.i.bf16 %v403_v34, %v402_v36  ;;  %v2661_v43 = vpack.i.bf16 %v409_v37, %v408_v39  ;;  %v2656_v44 = vpack.i.bf16 %v407_v38, %v406_v42 }
 0x188   :  { %v2441_v37 = vpack.c.bf16 %v3179_v14, %v3163_v10 }
 0x189   :  { %2652 = vrot.lane.b32.xlu1 %v2651_v40, %s2915_s15  ;;  %2647 = vrot.lane.b32.xlu0 %v2646_v41, %s2915_s15 }
 0x18a   :  { %v2131_v7 = vpop.f32.mrb[2].mxu1 }
 0x18b   :  { %v357_v8 = vadd.f32 %v2131_v7, %v1888_v4  ;;  %v351_v15 = vpop.f32.mrb[3].mxu1  ;;  %v1915_v7 = vld [vmem:[%s3675_s8 + $0x20] sm:$0xff] }
 0x18c   :  { %v352_v20 = vadd.f32 %v1888_v4, %v351_v15 }
 0x18d   :  { %2662 = vrot.lane.b32.xlu1 %v2661_v43, %s2915_s15  ;;  %2657 = vrot.lane.b32.xlu0 %v2656_v44, %s2915_s15  ;;  %v411_v21 = vmul.f32 %v3179_v14, %v357_v8  ;;  %v413_v22 = vmul.f32 %v3173_v13, %v357_v8  ;;  %v415_v29 = vmul.f32 %v3187_v16, %v357_v8  ;;  %v368_v44 = vld [vmem:[%s3683_s16] sm:$0xff]  ;;  %v1906_v13 = vld [vmem:[%s3673_s6 + $0x28] sm:$0xff] }
 0x18e   :  { %v410_v23 = vmul.f32 %v3163_v10, %v352_v20  ;;  %v412_v24 = vmul.f32 %v3157_v9, %v352_v20  ;;  %v414_v27 = vmul.f32 %v3193_v17, %v352_v20  ;;  %v416_v34 = vmul.f32 %v3208_v19, %v352_v20  ;;  %v1905_v9 = vld [vmem:[%s3673_s6 + $0x20] sm:$0xff]  ;;  %v1907_v16 = vld [vmem:[%s3673_s6 + $0x30] sm:$0xff]  ;;  %v1908_v17 = vld [vmem:[%s3673_s6 + $0x38] sm:$0xff] }
 0x18f   :  { %v417_v35 = vmul.f32 %v3200_v18, %v357_v8  ;;  %v2461_v18 = vpack.c.bf16 %v1908_v17, %v1907_v16  ;;  %v1916_v8 = vld [vmem:[%s3675_s8 + $0x28] sm:$0xff]  ;;  %v3311_v20 = vld [vmem:[%s3702_s4] sm:$0xff] }
 0x190   :  { %v2425_v25 = vpack.c.bf16 %v411_v21, %v410_v23  ;;  %v2429_v26 = vpack.c.bf16 %v413_v22, %v412_v24  ;;  %v2473_v15 = vpack.c.bf16 %v1916_v8, %v1915_v7  ;;  %v170_v21 = vld [vmem:[%s3703_s21] sm:$0xff]  ;;  %v3321_v24 = vld [vmem:[%s3702_s4 + $0x8] sm:$0xff] }
 0x191   :  { %v2437_v36 = vpack.c.bf16 %v417_v35, %v416_v34  ;;  %v938_v23 = vadd.f32 %v170_v21, %v3311_v20  ;;  %v3391_v16 = vld [vmem:[%s3684_s17] sm:$0xff] }
 0x192   :  { %2426 = vmatprep.subr.bf16.mxu1 %v2425_v25  ;;  %v3396_v17 = vld [vmem:[%s3684_s17 + $0x20] sm:$0xff] }
 0x193   :  { %2428 = vmatpush3.bf16.msra.mxu1 %v2425_v25  ;;  %v171_v25 = vld [vmem:[%s3703_s21 + $0x8] sm:$0xff] }
 0x194   :  { %2430 = vmatprep.subr.bf16.mxu1 %v2429_v26 }
 0x197   :  { %2432 = vmatpush3.bf16.msra.mxu1 %v2429_v26  ;;  %v3329_v26 = vld [vmem:[%s3702_s4 + $0x10] sm:$0xff] }
 0x1fb   :  { %v2653_v51 = vpop.permute.xlu1 %2652  ;;  %v2648_v52 = vpop.permute.xlu0 %2647 }
 0x1fc   :  { %v2655_v53 = vunpack.i.h.bf16 %v2653_v51  ;;  %v2654_v54 = vunpack.i.l.bf16 %v2653_v51  ;;  %v2650_v55 = vunpack.i.h.bf16 %v2648_v52  ;;  %v2649_v56 = vunpack.i.l.bf16 %v2648_v52 }
 0x1fd   :  { %v2457_v51 = vpack.c.bf16 %v1906_v13, %v1905_v9  ;;  %v3386_v9 = vld [vmem:[%s3684_s17 + $0x48] sm:$0xff] }
 0x1fe   :  { %v2401_v58 = vpack.c.bf16 %v2650_v55, %v2649_v56  ;;  %v2407_v59 = vpack.c.bf16 %v2655_v53, %v2654_v54 }
 0x1ff   :  { %v2658_v60 = vpop.permute.xlu0 %2657  ;;  %v2663_v0 = vpop.permute.xlu1 %2662 }
 0x200   :  { %2403 = vmatprep.subr.msk.bf16.mxu0 %vm3229_vm1, %v2401_v58  ;;  %v2660_v61 = vunpack.i.h.bf16 %v2658_v60  ;;  %v2659_v62 = vunpack.i.l.bf16 %v2658_v60  ;;  %v2665_v1 = vunpack.i.h.bf16 %v2663_v0  ;;  %v2664_v2 = vunpack.i.l.bf16 %v2663_v0  ;;  %v1909_v60 = vld [vmem:[#allocation8 + $0x1] ss:$0 sm:$0xff] }
 0x201   :  { %2406 = vmatpush3.bf16.xpose.msk.msra.mxu0 %vm3229_vm1, %v2401_v58 }
 0x202   :  { %2409 = vmatprep.subr.msk.bf16.mxu0 %vm3229_vm1, %v2407_v59  ;;  %v2413_v63 = vpack.c.bf16 %v2660_v61, %v2659_v62  ;;  %v2419_v3 = vpack.c.bf16 %v2665_v1, %v2664_v2 }
 0x209   :  { %2412 = vmatpush3.bf16.xpose.msk.msra.mxu0 %vm3229_vm1, %v2407_v59 }
 0x20a   :  { %2415 = vmatprep.subr.msk.bf16.mxu0 %vm3229_vm1, %v2413_v63 }
 0x211   :  { %2418 = vmatpush3.bf16.xpose.msk.msra.mxu0 %vm3229_vm1, %v2413_v63 }
 0x212   :  { %2421 = vmatprep.subr.msk.bf16.mxu0 %vm3229_vm1, %v2419_v3 }
 0x219   :  { %2424 = vmatpush3.bf16.xpose.msk.msra.mxu0 %vm3229_vm1, %v2419_v3 }
 0x21a   :  { %2458 = vmatprep.subr.bf16.mxu0 %v2457_v51 }
 0x220   :  { %2149 = vmatmul.mubr.msk.f32.vlgmr.msra.gmra.mrb[0].mxu0 %vm188_vm0, %v267_v28  ;;  %v2433_v28 = vpack.c.bf16 %v415_v29, %v414_v27  ;;  %v172_v27 = vld [vmem:[%s3703_s21 + $0x10] sm:$0xff]  ;;  %v939_v29 = vadd.f32 %v171_v25, %v3321_v24 }
 0x221   :  { %2460 = vmatpush3.bf16.msra.mxu0 %v2457_v51 }
 0x222   :  { %2434 = vmatprep.subr.bf16.mxu1 %v2433_v28  ;;  %2462 = vmatprep.subr.bf16.mxu0 %v2461_v18 }
 0x223   :  { %2436 = vmatpush3.bf16.msra.mxu1 %v2433_v28  ;;  %v940_v28 = vadd.f32 %v172_v27, %v3329_v26 }
 0x224   :  { %2438 = vmatprep.subr.bf16.mxu1 %v2437_v36 }
 0x225   :  { %2464 = vmatpush3.bf16.msra.mxu0 %v2461_v18  ;;  %v3401_v18 = vld [vmem:[%s3684_s17 + $0x40] sm:$0xff] }
 0x226   :  { %2474 = vmatprep.subr.bf16.mxu0 %v2473_v15 }
 0x227   :  { %2440 = vmatpush3.bf16.msra.mxu1 %v2437_v36 }
 0x228   :  { %2442 = vmatprep.subr.bf16.mxu1 %v2441_v37 }
 0x2f3   :  { %v2150_v30 = vpop.f32.mrb[0].mxu0 }
 0x2f4   :  { %v530_v31 = vpop.f32.mrb[1].mxu0  ;;  %v543_v32 = vsel %vm539_vm2, %v2150_v30, -inf }
 0x2f5   :  { %544 = vmax.xlane.f32.xlu1 %v543_v32  ;;  %v540_v33 = vsel %vm539_vm2, %v530_v31, -inf }
 0x2f6   :  { %541 = vmax.xlane.f32.xlu0 %v540_v33 }
 0x382   :  { %v545_v38 = vpop.xlane.xlu1 %544 }
 0x383   :  { %v547_v39 = vsub.f32 %v2150_v30, %v545_v38  ;;  %v542_v40 = vpop.xlane.xlu0 %541  ;;  %v3339_v30 = vld [vmem:[%s3702_s4 + $0x18] sm:$0xff] }
 0x384   :  { %v546_v41 = vsub.f32 %v530_v31, %v542_v40  ;;  %v173_v31 = vld [vmem:[%s3703_s21 + $0x18] sm:$0xff] }
 0x385   :  { %v550_v42 = vmul.f32 1.442695, %v547_v39  ;;  %v941_v32 = vadd.f32 %v173_v31, %v3339_v30 }
 0x386   :  { %v548_v43 = vmul.f32 1.442695, %v546_v41 }
 0x387   :  { %2666 = vpow2.f32 %v550_v42 }
 0x388   :  { %2668 = vpow2.f32 %v548_v43  ;;  %v848_v43 = vld [vmem:[%s3675_s8] sm:$0xff] }
 0x391   :  { %v2667_v45 = vpop.eup %2666 }
 0x392   :  { %v2669_v47 = vpop.eup %2668  ;;  %v553_v14 = vmul.f32 %v2667_v45, %v369_v46  ;;  %v850_v46 = vld [vmem:[%s3675_s8 + $0x10] sm:$0xff] }
 0x393   :  { %v552_v10 = vmul.f32 %v2669_v47, %v368_v44  ;;  %v849_v44 = vld [vmem:[%s3675_s8 + $0x8] sm:$0xff]  ;;  %v851_v47 = vld [vmem:[%s3675_s8 + $0x18] sm:$0xff] }
 0x394   :  { %v2465_v45 = vpack.c.bf16 %v849_v44, %v848_v43 }
 0x395   :  { %2167 = vmatprep.mubr.msk.f32.mxu1 %vm539_vm2, %v552_v10 }
 0x396   :  { %2168 = vmatmul.mubr.msk.f32.vlgmr.msra.gmra.mrb[4].mxu1 %vm539_vm2, %v553_v14 }
 0x397   :  { %2444 = vmatpush3.bf16.msra.mxu1 %v2441_v37  ;;  %2186 = vmatprep.mubr.msk.f32.mxu1 %vm539_vm2, %v552_v10  ;;  %v2469_v10 = vpack.c.bf16 %v851_v47, %v850_v46 }
 0x398   :  { %2446 = vmatprep.subr.bf16.mxu1 %v2445_v48 }
 0x39b   :  { %2448 = vmatpush3.bf16.msra.mxu1 %v2445_v48 }
 0x39c   :  { %2450 = vmatprep.subr.bf16.mxu1 %v2449_v49 }
 0x39f   :  { %2452 = vmatpush3.bf16.msra.mxu1 %v2449_v49  ;;  %v3376_v49 = vld [vmem:[%s3684_s17 + $0x8] sm:$0xff] }
 0x3a0   :  { %2454 = vmatprep.subr.bf16.mxu1 %v2453_v50 }
 0x3a3   :  { %2456 = vmatpush3.bf16.msra.mxu1 %v2453_v50  ;;  %v3381_v50 = vld [vmem:[%s3684_s17 + $0x28] sm:$0xff] }
 0x3a4   :  { %2466 = vmatprep.subr.bf16.mxu1 %v2465_v45 }
 0x3a6   :  { %2187 = vmatmul.mubr.msk.f32.vlgmr.msra.gmra.mrb[6].mxu1 %vm539_vm2, %v553_v14  ;;  %v1919_v14 = vld [vmem:[%s3676_s9 + $0x1] ss:$0 sm:$0xff] }
 0x3a7   :  { %2468 = vmatpush3.bf16.msra.mxu1 %v2465_v45  ;;  %v834_v45 = vlaneseq }
 0x3a8   :  { %2470 = vmatprep.subr.bf16.mxu1 %v2469_v10 }
 0x3ab   :  { %2472 = vmatpush3.bf16.msra.mxu1 %v2469_v10 }
 0x469   :  { %v2169_v19 = vpop.f32.mrb[4].mxu1 }
 0x46a   :  { %v626_v52 = vpop.f32.mrb[5].mxu1 }
 0x479   :  { %v2188_v53 = vpop.f32.mrb[6].mxu1 }
 0x47a   :  { %2670 = vrcp.f32 %v2188_v53  ;;  %v701_v54 = vpop.f32.mrb[7].mxu1  ;;  %v3411_v53 = vld [vmem:[%s3684_s17 + $0x60] sm:$0xff] }
 0x47b   :  { %2672 = vrcp.f32 %v701_v54 }
 0x484   :  { %v2671_v55 = vpop.eup %2670 }
 0x485   :  { %v2673_v56 = vpop.eup %2672  ;;  %v713_v58 = vmul.f32 %v2671_v55, %v2169_v19  ;;  %v3406_v19 = vld [vmem:[%s3684_s17 + $0x68] sm:$0xff] }
 0x486   :  { %v712_v59 = vmul.f32 %v2673_v56, %v626_v52 }
 0x488   :  { %2197 = vmatprep.mubr.msk.f32.mxu0 %vm188_vm0, %v712_v59  ;;  %v3424_v59 = vld [vmem:[%s3684_s17 + $0x38] sm:$0xff] }
 0x489   :  { %2198 = vmatmul.mubr.msk.f32.vlgmr.msra.gmra.mrb[2].mxu0 %vm188_vm0, %v713_v58  ;;  %v3419_v58 = vld [vmem:[%s3684_s17 + $0x18] sm:$0xff] }
 0x48a   :  { %2476 = vmatpush3.bf16.msra.mxu0 %v2473_v15  ;;  %2219 = vmatprep.mubr.msk.f32.mxu0 %vm188_vm0, %v938_v23  ;;  %v3454_v15 = vld [vmem:[%s3684_s17 + $0x50] sm:$0xff] }
 0x55c   :  { %v2199_v61 = vpop.f32.mrb[2].mxu0 }
 0x55d   :  { %v796_v62 = vpop.f32.mrb[3].mxu0  ;;  %v802_v63 = vadd.f32 %v2199_v61, %v1909_v60 }
 0x55e   :  { %v797_v0 = vadd.f32 %v1909_v60, %v796_v62 }
 0x55f   :  { %v806_v3 = vadd.f32 %v802_v63, %v3166_v11  ;;  %v1918_v11 = vld [vmem:[%s3675_s8 + $0x38] sm:$0xff] }
 0x560   :  { %v805_v1 = vadd.f32 %v797_v0, %v3148_v5  ;;  %v1917_v5 = vld [vmem:[%s3675_s8 + $0x30] sm:$0xff]  ;;  %v3432_v0 = vld [vmem:[%s3684_s17 + $0x58] sm:$0xff] }
 0x561   :  { %v810_v4 = vsel %vm188_vm0, %v806_v3, 0.0  ;;  %v2477_v22 = vpack.c.bf16 %v1918_v11, %v1917_v5  ;;  %v3449_v5 = vld [vmem:[%s3684_s17 + $0x30] sm:$0xff] }
 0x562   :  { %v807_v2 = vsel %vm188_vm0, %v805_v1, 0.0  ;;  %v3459_v11 = vld [vmem:[%s3684_s17 + $0x70] sm:$0xff] }
 0x563   :  { %808 = vadd.xlane.f32.xlu0 %v807_v2  ;;  %2478 = vmatprep.subr.bf16.mxu0 %v2477_v22  ;;  %v3442_v2 = vld [vmem:[%s3684_s17 + $0x10] sm:$0xff] }
 0x564   :  { %2480 = vmatpush3.bf16.msra.mxu0 %v2477_v22 }
 0x567   :  { %811 = vadd.xlane.f32.xlu0 %v810_v4  ;;  %2220 = vmatmul.mubr.msk.f32.vlgmr.msra.gmra.mrb[4].mxu0 %vm188_vm0, %v939_v29 }
 0x568   :  { %2222 = vmatprep.mubr.msk.f32.mxu0 %vm188_vm0, %v940_v28 }
 0x56b   :  { %2223 = vmatmul.mubr.msk.f32.gmra.mrb[6].mxu0 %vm188_vm0, %v941_v32 }
 0x5f0   :  { %v809_v33 = vpop.xlane.xlu0 %808 }
 0x5f1   :  { %v814_v34 = vmul.f32 0.03125, %v809_v33 }
 0x5f3   :  { %v3348_v35 = vsub.f32 %v805_v1, %v814_v34  ;;  %v3437_v1 = vld [vmem:[%s3684_s17 + $0x78] sm:$0xff] }
 0x5f4   :  { %v812_v36 = vpop.xlane.xlu0 %811 }
 0x5f5   :  { %v815_v37 = vmul.f32 0.03125, %v812_v36  ;;  %v818_v38 = vmul.f32 %v3348_v35, %v3348_v35 }
 0x5f7   :  { %v3352_v39 = vsub.f32 %v806_v3, %v815_v37  ;;  %v820_v40 = vsel %vm188_vm0, %v818_v38, 0.0 }
 0x5f8   :  { %821 = vadd.xlane.f32.xlu1 %v820_v40 }
 0x5f9   :  { %v819_v41 = vmul.f32 %v3352_v39, %v3352_v39 }
 0x5fb   :  { %v823_v42 = vsel %vm188_vm0, %v819_v41, 0.0 }
 0x5fc   :  { %824 = vadd.xlane.f32.xlu0 %v823_v42 }
 0x63a   :  { %v2221_v48 = vpop.f32.mrb[4].mxu0 }
 0x63b   :  { %v1036_v13 = vadd.f32 %v2221_v48, %v1919_v14  ;;  %v1030_v51 = vpop.f32.mrb[5].mxu0 }
 0x63c   :  { %v1031_v52 = vadd.f32 %v1919_v14, %v1030_v51  ;;  %v3498_v51 = vld [vmem:[#allocation14] sm:$0x3f] }
 0x63d   :  { %v1175_v54 = vmul.f32 %v3376_v49, %v1036_v13  ;;  %v1179_v55 = vmul.f32 %v3381_v50, %v1036_v13  ;;  %v1183_v56 = vmul.f32 %v3386_v9, %v1036_v13  ;;  %v1187_v3 = vmul.f32 %v3406_v19, %v1036_v13 }
 0x63e   :  { %v1174_v60 = vmul.f32 %v3391_v16, %v1031_v52  ;;  %v1178_v61 = vmul.f32 %v3396_v17, %v1031_v52  ;;  %v1182_v62 = vmul.f32 %v3401_v18, %v1031_v52  ;;  %v2224_v63 = vpop.f32.mrb[6].mxu0  ;;  %v1186_v4 = vmul.f32 %v3411_v53, %v1031_v52 }
 0x63f   :  { %v1046_v7 = vadd.f32 %v2224_v63, %v1919_v14  ;;  %v1040_v8 = vpop.f32.mrb[7].mxu0 }
 0x640   :  { %v2489_v21 = vpack.c.bf16 %v1175_v54, %v1174_v60  ;;  %v1041_v22 = vadd.f32 %v1919_v14, %v1040_v8  ;;  %v2501_v23 = vpack.c.bf16 %v1179_v55, %v1178_v61  ;;  %v2513_v25 = vpack.c.bf16 %v1183_v56, %v1182_v62 }
 0x641   :  { %v1177_v27 = vmul.f32 %v3419_v58, %v1046_v7  ;;  %v1181_v29 = vmul.f32 %v3424_v59, %v1046_v7  ;;  %v1185_v28 = vmul.f32 %v3432_v0, %v1046_v7  ;;  %v1189_v31 = vmul.f32 %v3437_v1, %v1046_v7 }
 0x642   :  { %2491 = vmatprep.subr.msk.bf16.mxu0 %vm3229_vm1, %v2489_v21  ;;  %v1176_v32 = vmul.f32 %v3442_v2, %v1041_v22  ;;  %v1180_v33 = vmul.f32 %v3449_v5, %v1041_v22  ;;  %v1184_v34 = vmul.f32 %v3454_v15, %v1041_v22  ;;  %v1188_v36 = vmul.f32 %v3459_v11, %v1041_v22 }
 0x643   :  { %2494 = vmatpush3.bf16.xpose.msk.msra.mxu0 %vm3229_vm1, %v2489_v21  ;;  %v2525_v37 = vpack.c.bf16 %v1187_v3, %v1186_v4  ;;  %v3491_v14 = vshrl.u32 %v834_v45, 7 }
 0x644   :  { %v2495_v38 = vpack.c.bf16 %v1177_v27, %v1176_v32  ;;  %v2507_v40 = vpack.c.bf16 %v1181_v29, %v1180_v33  ;;  %v2519_v41 = vpack.c.bf16 %v1185_v28, %v1184_v34  ;;  %v2531_v42 = vpack.c.bf16 %v1189_v31, %v1188_v36 }
 0x645   :  { %v836_v13 = vsub.s32 0, %v3491_v14  ;;  %v842_v52 = vsub.s32 1, %v3491_v14 }
 0x646   :  { %2497 = vmatprep.subr.msk.bf16.mxu0 %vm3229_vm1, %v2495_v38 }
 0x647   :  { %v837_v54 = vrot.slane %v3498_v51, %v836_v13  ;;  %v843_v60 = vrot.slane %v3498_v51, %v842_v52 }
 0x64b   :  { %2500 = vmatpush3.bf16.xpose.msk.msra.mxu0 %vm3229_vm1, %v2495_v38 }
 0x64c   :  { %2503 = vmatprep.subr.msk.bf16.mxu0 %vm3229_vm1, %v2501_v23 }
 0x653   :  { %2506 = vmatpush3.bf16.xpose.msk.msra.mxu0 %vm3229_vm1, %v2501_v23 }
 0x654   :  { %2509 = vmatprep.subr.msk.bf16.mxu0 %vm3229_vm1, %v2507_v40 }
 0x65b   :  { %2512 = vmatpush3.bf16.xpose.msk.msra.mxu0 %vm3229_vm1, %v2507_v40 }
 0x65c   :  { %2515 = vmatprep.subr.msk.bf16.mxu0 %vm3229_vm1, %v2513_v25 }
 0x663   :  { %2518 = vmatpush3.bf16.xpose.msk.msra.mxu0 %vm3229_vm1, %v2513_v25 }
 0x664   :  { %2521 = vmatprep.subr.msk.bf16.mxu0 %vm3229_vm1, %v2519_v41 }
 0x66b   :  { %2524 = vmatpush3.bf16.xpose.msk.msra.mxu0 %vm3229_vm1, %v2519_v41 }
 0x66c   :  { %2527 = vmatprep.subr.msk.bf16.mxu0 %vm3229_vm1, %v2525_v37 }
 0x673   :  { %2530 = vmatpush3.bf16.xpose.msk.msra.mxu0 %vm3229_vm1, %v2525_v37 }
 0x674   :  { %2533 = vmatprep.subr.msk.bf16.mxu0 %vm3229_vm1, %v2531_v42 }
 0x67b   :  { %2536 = vmatpush3.bf16.xpose.msk.msra.mxu0 %vm3229_vm1, %v2531_v42 }
 0x685   :  { %v822_v43 = vpop.xlane.xlu1 %821 }
 0x686   :  { %v826_v44 = vmul.f32 0.03125, %v822_v43 }
 0x688   :  { %v828_v46 = vadd.f32 1e-05, %v826_v44 }
 0x689   :  { %v825_v47 = vpop.xlane.xlu0 %824 }
 0x68a   :  { %2674 = vrsqrt.f32 %v828_v46  ;;  %v827_v10 = vmul.f32 0.03125, %v825_v47 }
 0x68c   :  { %v829_v48 = vadd.f32 1e-05, %v827_v10 }
 0x68e   :  { %2676 = vrsqrt.f32 %v829_v48 }
 0x694   :  { %v2675_v55 = vpop.eup %2674 }
 0x695   :  { %v832_v56 = vmul.f32 %v2675_v55, %v3348_v35 }
 0x697   :  { %v838_v61 = vmul.f32 %v837_v54, %v832_v56 }
 0x698   :  { %v2677_v62 = vpop.eup %2676 }
 0x699   :  { %v833_v63 = vmul.f32 %v2677_v62, %v3352_v39  ;;  %v3509_v3 = vadd.f32 %v843_v60, %v838_v61  ;;  %v1924_v39 = vld [vmem:[%s3675_s8 + $0x40] sm:$0xff] }
 0x69b   :  { %v839_v4 = vmul.f32 %v837_v54, %v833_v63  ;;  %v846_v7 = vadd.f32 %v3509_v3, %v3150_v6  ;;  %v1925_v6 = vld [vmem:[%s3675_s8 + $0x48] sm:$0xff] }
 0x69c   :  { %v2481_v21 = vpack.c.bf16 %v1925_v6, %v1924_v39 }
 0x69d   :  { %v3515_v8 = vadd.f32 %v843_v60, %v839_v4  ;;  %2208 = vmatprep.mubr.msk.f32.mxu1 %vm188_vm0, %v846_v7 }
 0x69e   :  { %2482 = vmatprep.subr.bf16.mxu1 %v2481_v21 }
 0x69f   :  { %v847_v35 = vadd.f32 %v3515_v8, %v3168_v12  ;;  %v1927_v12 = vld [vmem:[%s3675_s8 + $0x58] sm:$0xff] }
 0x6a0   :  { %v2485_v22 = vpack.c.bf16 %v1927_v12, %v1926_v57  ;;  %v2569_v57 = vpack.c.bf16 %v3376_v49, %v3391_v16 }
 0x6a1   :  { %2209 = vmatmul.mubr.msk.f32.vlgmr.msra.gmra.mrb[8].mxu1 %vm188_vm0, %v847_v35 }
 0x6a2   :  { %2233 = vmatprep.mubr.msk.f32.mxu1 %vm188_vm0, %v3311_v20  ;;  %2484 = vmatpush3.bf16.msra.mxu1 %v2481_v21  ;;  %v1912_v20 = vld [vmem:[%s3676_s9] ss:$0 sm:$0xff] }
 0x6a3   :  { %2486 = vmatprep.subr.bf16.mxu1 %v2485_v22 }
 0x6a6   :  { %2488 = vmatpush3.bf16.msra.mxu1 %v2485_v22 }
 0x6a9   :  { %2234 = vmatmul.mubr.msk.f32.vlgmr.msra.gmra.mrb[10].mxu1 %vm188_vm0, %v3321_v24  ;;  %v1928_v24 = vld [vmem:[%s3676_s9 + $0x2] ss:$0 sm:$0xff] }
 0x6aa   :  { %2236 = vmatprep.mubr.msk.f32.mxu1 %vm188_vm0, %v3329_v26 }
 0x6ad   :  { %2237 = vmatmul.mubr.msk.f32.gmra.mrb[12].mxu1 %vm188_vm0, %v3339_v30 }
 0x774   :  { %v2210_v23 = vpop.f32.mrb[8].mxu1 }
 0x775   :  { %v929_v25 = vpop.f32.mrb[9].mxu1  ;;  %v935_v29 = vadd.f32 %v2210_v23, %v1912_v20 }
 0x776   :  { %v930_v27 = vadd.f32 %v1912_v20, %v929_v25 }
 0x778   :  { %2271 = vmatprep.mubr.msk.f32.mxu0 %vm188_vm0, %v930_v27  ;;  %v1172_v27 = vld [vmem:[%s3685_s18] sm:$0xff] }
 0x779   :  { %2272 = vmatmul.mubr.msk.f32.vlgmr.msra.gmra.mrb[8].mxu0 %vm188_vm0, %v935_v29 }
 0x77c   :  { %v2235_v26 = vpop.f32.mrb[10].mxu1 }
 0x77d   :  { %v1143_v28 = vadd.f32 %v2235_v26, %v1928_v24  ;;  %v1137_v31 = vpop.f32.mrb[11].mxu1 }
 0x77e   :  { %v1138_v30 = vadd.f32 %v1928_v24, %v1137_v31  ;;  %v2577_v31 = vpack.c.bf16 %v3381_v50, %v3396_v17 }
 0x77f   :  { %v1191_v32 = vmul.f32 %v3376_v49, %v1143_v28  ;;  %v1195_v33 = vmul.f32 %v3381_v50, %v1143_v28  ;;  %v1199_v34 = vmul.f32 %v3386_v9, %v1143_v28  ;;  %v1203_v36 = vmul.f32 %v3406_v19, %v1143_v28 }
 0x780   :  { %v2238_v37 = vpop.f32.mrb[12].mxu1  ;;  %v1190_v38 = vmul.f32 %v3391_v16, %v1138_v30  ;;  %v1194_v40 = vmul.f32 %v3396_v17, %v1138_v30  ;;  %v1198_v41 = vmul.f32 %v3401_v18, %v1138_v30  ;;  %v1202_v42 = vmul.f32 %v3411_v53, %v1138_v30 }
 0x781   :  { %v1153_v43 = vadd.f32 %v2238_v37, %v1928_v24  ;;  %v1147_v44 = vpop.f32.mrb[13].mxu1  ;;  %v2573_v28 = vpack.c.bf16 %v3419_v58, %v3442_v2  ;;  %v2581_v30 = vpack.c.bf16 %v3424_v59, %v3449_v5  ;;  %v2593_v50 = vpack.c.bf16 %v3406_v19, %v3411_v53  ;;  %v1953_v19 = vld [vmem:[%s3675_s8 + $0x70] sm:$0xff]  ;;  %v1954_v53 = vld [vmem:[%s3675_s8 + $0x78] sm:$0xff]  ;;  %v1955_v37 = vld [vmem:[%s3676_s9 + $0x3] ss:$0 sm:$0xff] }
 0x782   :  { %v1148_v45 = vadd.f32 %v1928_v24, %v1147_v44  ;;  %v2537_v46 = vpack.c.bf16 %v1191_v32, %v1190_v38  ;;  %v2545_v47 = vpack.c.bf16 %v1195_v33, %v1194_v40  ;;  %v2553_v10 = vpack.c.bf16 %v1199_v34, %v1198_v41  ;;  %v1173_v24 = vld [vmem:[%s3685_s18 + $0x8] sm:$0xff] }
 0x783   :  { %v1193_v48 = vmul.f32 %v3419_v58, %v1153_v43  ;;  %v1197_v13 = vmul.f32 %v3424_v59, %v1153_v43  ;;  %v1201_v52 = vmul.f32 %v3432_v0, %v1153_v43  ;;  %v2561_v54 = vpack.c.bf16 %v1203_v36, %v1202_v42 }
 0x784   :  { %2538 = vmatprep.subr.bf16.mxu1 %v2537_v46  ;;  %v1192_v55 = vmul.f32 %v3442_v2, %v1148_v45  ;;  %v1196_v56 = vmul.f32 %v3449_v5, %v1148_v45  ;;  %v1200_v60 = vmul.f32 %v3454_v15, %v1148_v45  ;;  %v1204_v61 = vmul.f32 %v3459_v11, %v1148_v45 }
 0x785   :  { %2540 = vmatpush3.bf16.msra.mxu1 %v2537_v46  ;;  %v1205_v62 = vmul.f32 %v3437_v1, %v1153_v43  ;;  %v2585_v32 = vpack.c.bf16 %v3386_v9, %v3401_v18  ;;  %v2589_v58 = vpack.c.bf16 %v3432_v0, %v3454_v15  ;;  %v2597_v17 = vpack.c.bf16 %v3437_v1, %v3459_v11  ;;  %v1951_v9 = vld [vmem:[%s3675_s8 + $0x60] sm:$0xff]  ;;  %v1952_v18 = vld [vmem:[%s3675_s8 + $0x68] sm:$0xff] }
 0x786   :  { %v2541_v63 = vpack.c.bf16 %v1193_v48, %v1192_v55  ;;  %v2549_v4 = vpack.c.bf16 %v1197_v13, %v1196_v56  ;;  %v2557_v7 = vpack.c.bf16 %v1201_v52, %v1200_v60  ;;  %v2601_v59 = vpack.c.bf16 %v1952_v18, %v1951_v9 }
 0x787   :  { %v2565_v35 = vpack.c.bf16 %v1205_v62, %v1204_v61  ;;  %v2605_v0 = vpack.c.bf16 %v1954_v53, %v1953_v19  ;;  %v1633_v61 = vld [vmem:[#allocation10 + $0x8] sm:$0xff] }
 0x788   :  { %2542 = vmatprep.subr.bf16.mxu1 %v2541_v63  ;;  %2602 = vmatprep.subr.bf16.mxu0 %v2601_v59  ;;  %v1732_v53 = vld [vmem:[%s3679_s12 + $0x30] sm:$0xff] }
 0x789   :  { %2544 = vmatpush3.bf16.msra.mxu1 %v2541_v63  ;;  %2604 = vmatpush3.bf16.msra.mxu0 %v2601_v59  ;;  %v1634_v63 = vld [vmem:[#allocation10 + $0x10] sm:$0xff] }
 0x78a   :  { %2546 = vmatprep.subr.bf16.mxu1 %v2545_v47  ;;  %2606 = vmatprep.subr.bf16.mxu0 %v2605_v0 }
 0x78d   :  { %2548 = vmatpush3.bf16.msra.mxu1 %v2545_v47  ;;  %2608 = vmatpush3.bf16.msra.mxu0 %v2605_v0  ;;  %v1733_v0 = vld [vmem:[%s3679_s12 + $0x38] sm:$0xff] }
 0x78e   :  { %2550 = vmatprep.subr.bf16.mxu1 %v2549_v4 }
 0x791   :  { %2552 = vmatpush3.bf16.msra.mxu1 %v2549_v4  ;;  %v1635_v4 = vld [vmem:[#allocation10 + $0x18] sm:$0xff] }
 0x792   :  { %2554 = vmatprep.subr.bf16.mxu1 %v2553_v10 }
 0x795   :  { %2556 = vmatpush3.bf16.msra.mxu1 %v2553_v10 }
 0x796   :  { %2558 = vmatprep.subr.bf16.mxu1 %v2557_v7 }
 0x799   :  { %2560 = vmatpush3.bf16.msra.mxu1 %v2557_v7  ;;  %v2613_v7 = vpack.c.bf16 %v1635_v4, %v1634_v63 }
 0x79a   :  { %2562 = vmatprep.subr.bf16.mxu1 %v2561_v54 }
 0x79d   :  { %2564 = vmatpush3.bf16.msra.mxu1 %v2561_v54 }
 0x79e   :  { %2566 = vmatprep.subr.bf16.mxu1 %v2565_v35 }
 0x7a1   :  { %2568 = vmatpush3.bf16.msra.mxu1 %v2565_v35  ;;  %v1726_v35 = vld [vmem:[%s3679_s12] sm:$0xff] }
 0x7a2   :  { %2570 = vmatprep.subr.bf16.mxu1 %v2569_v57 }
 0x84c   :  { %v2273_v39 = vpop.f32.mrb[8].mxu0 }
 0x84d   :  { %1337 = vmax.xlane.f32.xlu0 %v2273_v39  ;;  %v1326_v6 = vpop.f32.mrb[9].mxu0 }
 0x84e   :  { %1335 = vmax.xlane.f32.xlu1 %v1326_v6 }
 0x8da   :  { %v1338_v21 = vpop.xlane.xlu0 %1337 }
 0x8db   :  { %v1340_v12 = vsub.f32 %v2273_v39, %v1338_v21  ;;  %v1336_v22 = vpop.xlane.xlu1 %1335  ;;  %v1727_v39 = vld [vmem:[%s3679_s12 + $0x8] sm:$0xff]  ;;  %v1729_v21 = vld [vmem:[%s3679_s12 + $0x18] sm:$0xff] }
 0x8dc   :  { %v1339_v20 = vsub.f32 %v1326_v6, %v1336_v22  ;;  %v1728_v6 = vld [vmem:[%s3679_s12 + $0x10] sm:$0xff]  ;;  %v1730_v22 = vld [vmem:[%s3679_s12 + $0x20] sm:$0xff] }
 0x8dd   :  { %v1343_v23 = vmul.f32 1.442695, %v1340_v12  ;;  %v2621_v12 = vpack.c.bf16 %v1729_v21, %v1728_v6 }
 0x8de   :  { %v1341_v25 = vmul.f32 1.442695, %v1339_v20  ;;  %v1731_v20 = vld [vmem:[%s3679_s12 + $0x28] sm:$0xff]  ;;  %s2916_s12 = smov [#allocation16]  }
 0x8df   :  { %2678 = vpow2.f32 %v1343_v23  ;;  %v2625_v23 = vpack.c.bf16 %v1731_v20, %v1730_v22  ;;  %s1869_s21 = sshll.u32 %s2916_s12, 4  ;;  %s1870_s21 = int_to_ptr.vmem [resolvable:$true] %s1869_s21 }
 0x8e0   :  { %2680 = vpow2.f32 %v1341_v25  ;;  %s2870_s18 = scalar_lea.vmem %s1870_s21, 256  ;;  %p2875_p9 = scmp.lt.s32.totalorder %s1870_s21, %s1870_s21 }
 0x8e1   :  { %p2871_p8 = scmp.ne.s32.totalorder %s1870_s21, %s2870_s18  ;;  %p2876_p10 = scmp.lt.s32.totalorder %s2870_s18, %s2870_s18 }
 0x8e3   :  { %p2877_p11 = por %p2876_p10, %p2875_p9 }
 0x8e5   :  { %p2878_p12 = pnand %p2877_p11, %p2871_p8 }
 0x8e9   :  { %v2679_v29 = vpop.eup %2678 }
 0x8ea   :  { %v2681_v26 = vpop.eup %2680  ;;  %v1346_v16 = vmul.f32 %v2679_v29, %v1173_v24 }
 0x8eb   :  { %v1345_v49 = vmul.f32 %v2681_v26, %v1172_v27 }
 0x8ed   :  { %2306 = vmatprep.mubr.f32.mxu1 %v1345_v49 }
 0x8ee   :  { %2307 = vmatmul.mubr.f32.vlgmr.msra.gmra.mrb[14].mxu1 %v1346_v16 }
 0x8ef   :  { %2572 = vmatpush3.bf16.msra.mxu1 %v2569_v57  ;;  %2341 = vmatprep.mubr.f32.mxu1 %v1345_v49  ;;  %v2617_v57 = vpack.c.bf16 %v1727_v39, %v1726_v35  ;;  %v1852_v35 = vsub.s32 4, %v3491_v14  ;;  %v1858_v39 = vsub.s32 5, %v3491_v14 }
 0x8f0   :  { %2574 = vmatprep.subr.bf16.mxu1 %v2573_v28 }
 0x8f1   :  { %2618 = vmatprep.subr.bf16.mxu0 %v2617_v57  ;;  %v1853_v6 = vrot.slane %v3498_v51, %v1852_v35  ;;  %v1859_v22 = vrot.slane %v3498_v51, %v1858_v39 }
 0x8f3   :  { %2576 = vmatpush3.bf16.msra.mxu1 %v2573_v28  ;;  %v1628_v28 = vsub.s32 3, %v3491_v14 }
 0x8f4   :  { %2578 = vmatprep.subr.bf16.mxu1 %v2577_v31 }
 0x8f7   :  { %2580 = vmatpush3.bf16.msra.mxu1 %v2577_v31 }
 0x8f8   :  { %2582 = vmatprep.subr.bf16.mxu1 %v2581_v30 }
 0x8fb   :  { %2584 = vmatpush3.bf16.msra.mxu1 %v2581_v30 }
 0x8fc   :  { %2586 = vmatprep.subr.bf16.mxu1 %v2585_v32 }
 0x8ff   :  { %2588 = vmatpush3.bf16.msra.mxu1 %v2585_v32 }
 0x900   :  { %2590 = vmatprep.subr.bf16.mxu1 %v2589_v58 }
 0x903   :  { %2592 = vmatpush3.bf16.msra.mxu1 %v2589_v58 }
 0x904   :  { %2594 = vmatprep.subr.bf16.mxu1 %v2593_v50 }
 0x907   :  { %2596 = vmatpush3.bf16.msra.mxu1 %v2593_v50 }
 0x908   :  { %2598 = vmatprep.subr.bf16.mxu1 %v2597_v17 }
 0x90b   :  { %2600 = vmatpush3.bf16.msra.mxu1 %v2597_v17  ;;  %v1629_v17 = vrot.slane %v3498_v51, %v1628_v28 }
 0x90e   :  { %2342 = vmatmul.mubr.f32.vlgmr.msra.gmra.mrb[16].mxu1 %v1346_v16  ;;  %v1622_v16 = vsub.s32 2, %v3491_v14 }
 0x910   :  { %v1623_v31 = vrot.slane %v3498_v51, %v1622_v16 }
 0x9c1   :  { %v2308_v1 = vpop.f32.mrb[14].mxu1 }
 0x9c2   :  { %v1413_v2 = vpop.f32.mrb[15].mxu1 }
 0x9e1   :  { %v2343_v5 = vpop.f32.mrb[16].mxu1 }
 0x9e2   :  { %2682 = vrcp.f32 %v2343_v5  ;;  %v1488_v15 = vpop.f32.mrb[17].mxu1 }
 0x9e3   :  { %2684 = vrcp.f32 %v1488_v15 }
 0x9ec   :  { %v2683_v11 = vpop.eup %2682 }
 0x9ed   :  { %v2685_v33 = vpop.eup %2684  ;;  %v1500_v34 = vmul.f32 %v2683_v11, %v2308_v1  ;;  %v2629_v1 = vpack.c.bf16 %v1733_v0, %v1732_v53 }
 0x9ee   :  { %v1499_v36 = vmul.f32 %v2685_v33, %v1413_v2  ;;  %v1958_v2 = vld [vmem:[#allocation11] ss:$0 sm:$0xff] }
 0x9f0   :  { %2352 = vmatprep.mubr.msk.f32.mxu0 %vm188_vm0, %v1499_v36 }
 0x9f1   :  { %2353 = vmatmul.mubr.msk.f32.vlgmr.msra.gmra.mrb[10].mxu0 %vm188_vm0, %v1500_v34 }
 0x9f2   :  { %2620 = vmatpush3.bf16.msra.mxu0 %v2617_v57 }
 0x9f3   :  { %2622 = vmatprep.subr.bf16.mxu0 %v2621_v12 }
 0x9f6   :  { %2624 = vmatpush3.bf16.msra.mxu0 %v2621_v12 }
 0x9f7   :  { %2626 = vmatprep.subr.bf16.mxu0 %v2625_v23 }
 0x9fa   :  { %2628 = vmatpush3.bf16.msra.mxu0 %v2625_v23 }
 0x9fb   :  { %2630 = vmatprep.subr.bf16.mxu0 %v2629_v1 }
 0x9fe   :  { %2632 = vmatpush3.bf16.msra.mxu0 %v2629_v1 }
 0xac4   :  { %v2354_v38 = vpop.f32.mrb[10].mxu0 }
 0xac5   :  { %v1589_v40 = vadd.f32 %v2354_v38, %v1955_v37  ;;  %v1583_v41 = vpop.f32.mrb[11].mxu0 }
 0xac6   :  { %v1584_v42 = vadd.f32 %v1955_v37, %v1583_v41  ;;  %v1961_v37 = vld [vmem:[#allocation13] ss:$0 sm:$0xff] }
 0xac7   :  { %v1593_v43 = vadd.f32 %v1589_v40, %v3515_v8 }
 0xac8   :  { %v1592_v44 = vadd.f32 %v1584_v42, %v3509_v3  ;;  %v1632_v3 = vld [vmem:[#allocation10] sm:$0xff] }
 0xac9   :  { %v1597_v45 = vsel %vm188_vm0, %v1593_v43, 0.0  ;;  %v2609_v62 = vpack.c.bf16 %v1633_v61, %v1632_v3 }
 0xaca   :  { %1598 = vadd.xlane.f32.xlu0 %v1597_v45  ;;  %v1594_v46 = vsel %vm188_vm0, %v1592_v44, 0.0 }
 0xacb   :  { %1595 = vadd.xlane.f32.xlu1 %v1594_v46  ;;  %2610 = vmatprep.subr.bf16.mxu1 %v2609_v62 }
 0xacc   :  { %2612 = vmatpush3.bf16.msra.mxu1 %v2609_v62 }
 0xacd   :  { %2614 = vmatprep.subr.bf16.mxu1 %v2613_v7 }
 0xad0   :  { %2616 = vmatpush3.bf16.msra.mxu1 %v2613_v7 }
 0xb57   :  { %v1599_v47 = vpop.xlane.xlu0 %1598 }
 0xb58   :  { %v1601_v10 = vmul.f32 0.03125, %v1599_v47  ;;  %v1596_v48 = vpop.xlane.xlu1 %1595 }
 0xb59   :  { %v1600_v13 = vmul.f32 0.03125, %v1596_v48 }
 0xb5a   :  { %v1603_v52 = vsub.f32 %v1593_v43, %v1601_v10 }
 0xb5b   :  { %v1602_v54 = vsub.f32 %v1592_v44, %v1600_v13 }
 0xb5c   :  { %v1605_v55 = vmul.f32 %v1603_v52, %v1603_v52 }
 0xb5d   :  { %v1604_v56 = vmul.f32 %v1602_v54, %v1602_v54 }
 0xb5e   :  { %v1609_v60 = vsel %vm188_vm0, %v1605_v55, 0.0 }
 0xb5f   :  { %1610 = vadd.xlane.f32.xlu0 %v1609_v60  ;;  %v1606_v8 = vsel %vm188_vm0, %v1604_v56, 0.0 }
 0xb60   :  { %1607 = vadd.xlane.f32.xlu1 %v1606_v8 }
 0xbec   :  { %v1611_v25 = vpop.xlane.xlu0 %1610 }
 0xbed   :  { %v1613_v27 = vmul.f32 0.03125, %v1611_v25  ;;  %v1608_v29 = vpop.xlane.xlu1 %1607 }
 0xbee   :  { %v1612_v24 = vmul.f32 0.03125, %v1608_v29 }
 0xbef   :  { %v1615_v26 = vadd.f32 1e-05, %v1613_v27 }
 0xbf0   :  { %v1614_v49 = vadd.f32 1e-05, %v1612_v24 }
 0xbf1   :  { %2686 = vrsqrt.f32 %v1615_v26 }
 0xbf2   :  { %2688 = vrsqrt.f32 %v1614_v49 }
 0xbfb   :  { %v2687_v30 = vpop.eup %2686 }
 0xbfc   :  { %v2689_v32 = vpop.eup %2688  ;;  %v1619_v58 = vmul.f32 %v2687_v30, %v1603_v52 }
 0xbfd   :  { %v1618_v50 = vmul.f32 %v2689_v32, %v1602_v54 }
 0xbfe   :  { %v1625_v9 = vmul.f32 %v1623_v31, %v1619_v58 }
 0xbff   :  { %v1624_v18 = vmul.f32 %v1623_v31, %v1618_v50 }
 0xc00   :  { %v1631_v19 = vadd.f32 %v1629_v17, %v1625_v9 }
 0xc01   :  { %v1630_v59 = vadd.f32 %v1629_v17, %v1624_v18 }
 0xc03   :  { %2363 = vmatprep.mubr.msk.f32.mxu1 %vm188_vm0, %v1630_v59 }
 0xc04   :  { %2364 = vmatmul.mubr.msk.f32.vlgmr.msra.gmra.mrb[18].mxu1 %vm188_vm0, %v1631_v19 }
 0xcd7   :  { %v2365_v5 = vpop.f32.mrb[18].mxu1 }
 0xcd8   :  { %v1721_v15 = vadd.f32 %v2365_v5, %v1958_v2  ;;  %v1715_v11 = vpop.f32.mrb[19].mxu1 }
 0xcd9   :  { %v1716_v33 = vadd.f32 %v1958_v2, %v1715_v11 }
 0xcda   :  { %v1725_v36 = vmax.f32 %v1721_v15, 0.0 }
 0xcdb   :  { %v1724_v34 = vmax.f32 %v1716_v33, 0.0 }
 0xcdd   :  { %2382 = vmatprep.mubr.msk.f32.mxu0 %vm539_vm2, %v1724_v34 }
 0xcde   :  { %2383 = vmatmul.mubr.msk.f32.vlgmr.msra.gmra.mrb[12].mxu0 %vm539_vm2, %v1725_v36 }
 0xdb1   :  { %v2384_v38 = vpop.f32.mrb[12].mxu0 }
 0xdb2   :  { %v1819_v40 = vadd.f32 %v2384_v38, %v1961_v37  ;;  %v1813_v41 = vpop.f32.mrb[13].mxu0 }
 0xdb3   :  { %v1814_v42 = vadd.f32 %v1961_v37, %v1813_v41 }
 0xdb4   :  { %v1823_v43 = vadd.f32 %v1819_v40, %v1631_v19 }
 0xdb5   :  { %v1822_v44 = vadd.f32 %v1814_v42, %v1630_v59 }
 0xdb6   :  { %v1827_v45 = vsel %vm188_vm0, %v1823_v43, 0.0 }
 0xdb7   :  { %1828 = vadd.xlane.f32.xlu0 %v1827_v45  ;;  %v1824_v46 = vsel %vm188_vm0, %v1822_v44, 0.0 }
 0xdb8   :  { %1825 = vadd.xlane.f32.xlu1 %v1824_v46 }
 0xe44   :  { %v1829_v47 = vpop.xlane.xlu0 %1828 }
 0xe45   :  { %v1831_v10 = vmul.f32 0.03125, %v1829_v47  ;;  %v1826_v48 = vpop.xlane.xlu1 %1825 }
 0xe46   :  { %v1830_v13 = vmul.f32 0.03125, %v1826_v48 }
 0xe47   :  { %v1833_v52 = vsub.f32 %v1823_v43, %v1831_v10 }
 0xe48   :  { %v1832_v54 = vsub.f32 %v1822_v44, %v1830_v13 }
 0xe49   :  { %v1835_v55 = vmul.f32 %v1833_v52, %v1833_v52 }
 0xe4a   :  { %v1834_v56 = vmul.f32 %v1832_v54, %v1832_v54 }
 0xe4b   :  { %v1839_v60 = vsel %vm188_vm0, %v1835_v55, 0.0 }
 0xe4c   :  { %1840 = vadd.xlane.f32.xlu0 %v1839_v60  ;;  %v1836_v8 = vsel %vm188_vm0, %v1834_v56, 0.0 }
 0xe4d   :  { %1837 = vadd.xlane.f32.xlu1 %v1836_v8 }
 0xed9   :  { %v1841_v3 = vpop.xlane.xlu0 %1840 }
 0xeda   :  { %v1843_v61 = vmul.f32 0.03125, %v1841_v3  ;;  %v1838_v62 = vpop.xlane.xlu1 %1837 }
 0xedb   :  { %v1842_v63 = vmul.f32 0.03125, %v1838_v62 }
 0xedc   :  { %v1845_v4 = vadd.f32 1e-05, %v1843_v61 }
 0xedd   :  { %v1844_v7 = vadd.f32 1e-05, %v1842_v63 }
 0xede   :  { %2690 = vrsqrt.f32 %v1845_v4 }
 0xedf   :  { %2692 = vrsqrt.f32 %v1844_v7 }
 0xee8   :  { %v2691_v57 = vpop.eup %2690 }
 0xee9   :  { %v2693_v21 = vpop.eup %2692  ;;  %v1849_v12 = vmul.f32 %v2691_v57, %v1833_v52 }
 0xeea   :  { %v1848_v20 = vmul.f32 %v2693_v21, %v1832_v54 }
 0xeeb   :  { %v1855_v23 = vmul.f32 %v1853_v6, %v1849_v12 }
 0xeec   :  { %v1854_v25 = vmul.f32 %v1853_v6, %v1848_v20 }
 0xeed   :  { %v1861_v27 = vadd.f32 %v1859_v22, %v1855_v23 }
 0xeee   :  { %v1860_v29 = vadd.f32 %v1859_v22, %v1854_v25 }
 0xeef   :  { %1863 = vst.msk [vmem:[#allocation16 + $0x8] sm:$0xff] %vm188_vm0, %v1861_v27 }
 0xef0   :  { %1862 = vst.msk [vmem:[#allocation16] sm:$0xff] %vm188_vm0, %v1860_v29 }
 0xef1   :  { %2881 = shalt.err (!%p2878_p12)
}
 0xef2   :  { %s2882_s1 = scalar_lea.hbm %s3686_s19, 256 }
 0xef3   :  { %p2883_p13 = scmp.ne.s32.totalorder %s3686_s19, %s2882_s1  ;;  %p2886_p0 = scmp.lt.u32.totalorder %s2882_s1, %s3686_s19 }
 0xef5   :  { %p2888_p1 = pnand %p2886_p0, %p2883_p13 }
 0xef7   :  { %2891 = shalt.err (!%p2888_p1)
}
 0xef8   :  { %1875 = dma.vmem_to_hbm [thread:$0]  %s1870_s21, 256, %s3686_s19, [#allocation4], %s3699_s11, %s3699_s11, %s2907_s29  }
 0xef9   :  { %2902 = dma.done.wait [#allocation4], 256  }
 0xefa   :  { %2903 = vsyncadd [#allocation4], 4294967040 }
 0xefb   :  { %1879 = vsyncpa [#allocation3], 1 }
 0xefc   :  { %1880 = vsyncpa [#allocation6], 1 }
 0xefd   :  { %1881 = vsyncpa [#allocation9], 1 }
 0xefe   :  { %1882 = vsyncpa [#allocation12], 1 }
 0xeff   :  { %1883 = vsyncpa [#allocation15], 1 }
 0xf00   :  { %1884 = vsyncpa [#allocation4], 1 }

</bundles_post_ra>
